<compile_context>
chip_gen: v5e
topology: v5e:2x2
jax: 0.10.0
libtpu: 0.0.40
codegen_flags: <defaults>
</compile_context>

<pallas_src>
import functools

import jax
import jax.numpy as jnp
from jax import lax
from jax.experimental import pallas as pl
from jax.experimental.pallas import tpu as pltpu


def _round_up(x, m):
    return ((x + m - 1) // m) * m


def _sigma_kernel(w_ref, wblk_ref, cv_ref, out_ref, *, half_lambda):
    """Grid step j: sigma offsets (scaled by 0.5*Lambda) for a block of label classes.

    out[k, c] = 0.5*Lambda * (w_c - w_k) CV_k (w_c - w_k)^T   (no symmetry assumption).
    """
    w = w_ref[...].astype(jnp.float32)       # (C, A)  full weight, resident
    wb = wblk_ref[...].astype(jnp.float32)   # (kb, A) weights of this class block
    cv = cv_ref[...].astype(jnp.float32)     # (kb, A, A) covariances of this block

    d = w[None, :, :] - wb[:, None, :]       # (kb, C, A)
    # TD[k, c, :] = (w_c - w_k) @ CV_k  -- one batched MXU matmul per block
    td = lax.dot_general(
        d, cv, (((2,), (1,)), ((0,), (0,))),
        precision=lax.Precision.HIGHEST,
        preferred_element_type=jnp.float32)  # (kb, C, A)

    # quadratic form via elementwise mul + lane-axis reduce (VPU/XLU, no CxC Q)
    out_ref[...] = half_lambda * jnp.sum(td * d, axis=2)        # (kb, C)


def _ce_kernel(labels_ref, pred_ref, sig_ref, out_ref, *, batch_n, tile_b):
    """Grid step i: partial sum of augmented cross-entropy over one batch tile."""
    i = pl.program_id(0)
    labels = labels_ref[...]                       # (B, 1) int32
    pred = pred_ref[...].astype(jnp.float32)       # (B, C) cast in-kernel
    sig = sig_ref[...]                             # (C, C) f32, row k = offsets for label k
    b_dim, c_dim = pred.shape

    lane = lax.broadcasted_iota(jnp.int32, (b_dim, c_dim), 1)
    oh = lane == labels                            # (B, C) one-hot of labels
    oh_f = oh.astype(jnp.float32)

    # gather per-sample sigma rows: (B, C) = one_hot @ sig  (MXU; HIGHEST keeps f32 exact)
    sig_g = jnp.dot(oh_f, sig,
                    precision=lax.Precision.HIGHEST,
                    preferred_element_type=jnp.float32)
    aug = pred + sig_g                             # 0.5*Lambda already folded into sig

    # stabilized per-sample cross entropy
    mx = jnp.max(aug, axis=1, keepdims=True)
    lse = mx + jnp.log(jnp.sum(jnp.exp(aug - mx), axis=1, keepdims=True))
    tgt = jnp.sum(jnp.where(oh, aug, 0.0), axis=1, keepdims=True)
    loss_b = lse - tgt                             # (B, 1)

    # mask rows beyond N (last ragged tile); garbage rows are discarded by the select
    row = lax.broadcasted_iota(jnp.int32, (b_dim, 1), 0)
    valid = (i * tile_b + row) < batch_n
    total = jnp.sum(jnp.where(valid, loss_b, 0.0), axis=0, keepdims=True)  # (1, 1)

    # lane-dense partial-sum store (avoid masked 1-lane vst)
    out_ref[...] = jnp.broadcast_to(total, (1, 128))


def pcfea_loss_no_mean(weight, features, pred, labels, Lambda, cv, *,
                       tile_b=512, class_block=32):
    """weight: (C, A) fc weight; features: (N, A); pred: (N, C); labels: (N,); cv: (C, A, A)."""
    N, A = features.shape
    C = weight.shape[0]
    assert pred.shape == (N, C) and cv.shape == (C, A, A) and labels.shape == (N,)

    # ---------------- Kernel A: per-class sigma table ----------------
    if C <= class_block:
        kb = C                                      # single full block
    else:
        kb = max(8, (class_block // 8) * 8)         # sublane-aligned class blocks
    num_kblocks = pl.cdiv(C, kb)

    est_a = 4 * (2 * C * A + 2 * kb * A + 2 * kb * A * A + 2 * kb * C + 4 * kb * C * A)
    vmem_a = int(min(max(2 * est_a, 16 * 1024 * 1024), 96 * 1024 * 1024))

    sig = pl.pallas_call(
        functools.partial(_sigma_kernel, half_lambda=0.5 * float(Lambda)),
        out_shape=jax.ShapeDtypeStruct((C, C), jnp.float32),
        grid_spec=pltpu.PrefetchScalarGridSpec(
            num_scalar_prefetch=0,
            grid=(num_kblocks,),
            in_specs=[
                pl.BlockSpec((C, A), lambda j: (0, 0)),        # W resident (native dtype)
                pl.BlockSpec((kb, A), lambda j: (j, 0)),       # w_k block
                pl.BlockSpec((kb, A, A), lambda j: (j, 0, 0)),  # CV block streamed (native dtype)
            ],
            out_specs=pl.BlockSpec((kb, C), lambda j: (j, 0)),
        ),
        compiler_params=pltpu.CompilerParams(
            dimension_semantics=("parallel",), vmem_limit_bytes=vmem_a),
    )(weight, weight, cv)

    # ---------------- Kernel B: batched augmented CE ----------------
    if N <= tile_b:
        tb = N                                      # block == full batch dim
    else:
        tb = _round_up(min(tile_b, N), 8)
    num_tiles = pl.cdiv(N, tb)

    labels2d = labels.astype(jnp.int32).reshape(N, 1)   # tiny; pred/cv are NOT copied or padded

    est_b = 4 * (2 * tb + 6 * tb * C + 2 * C * C + 2 * 128)
    vmem_b = int(min(max(2 * est_b, 16 * 1024 * 1024), 96 * 1024 * 1024))

    partial = pl.pallas_call(
        functools.partial(_ce_kernel, batch_n=N, tile_b=tb),
        out_shape=jax.ShapeDtypeStruct((num_tiles, 1, 128), jnp.float32),
        grid_spec=pltpu.PrefetchScalarGridSpec(
            num_scalar_prefetch=0,
            grid=(num_tiles,),
            in_specs=[
                pl.BlockSpec((tb, 1), lambda i: (i, 0)),       # labels tile
                pl.BlockSpec((tb, C), lambda i: (i, 0)),       # pred streamed, native dtype
                pl.BlockSpec((C, C), lambda i: (0, 0)),        # sigma table resident
            ],
            out_specs=pl.BlockSpec((None, 1, 128), lambda i: (i, 0, 0)),
        ),
        compiler_params=pltpu.CompilerParams(
            dimension_semantics=("parallel",), vmem_limit_bytes=vmem_b),
    )(labels2d, pred, sig)

    return jnp.sum(partial[:, 0, 0]) / N


def _ref_loss(weight, features, pred, labels, Lambda, cv):
    """Pure-JAX reference mirroring the PyTorch forward."""
    wy = weight[labels]                                  # (N, A)
    diff = weight[None, :, :] - wy[:, None, :]           # (N, C, A)
    cvn = cv[labels]                                     # (N, A, A)
    t = jnp.einsum('nca,nab->ncb', diff, cvn, precision=lax.Precision.HIGHEST)
    sigma2 = Lambda * jnp.sum(t * diff, axis=-1)         # (N, C)
    aug = pred + 0.5 * sigma2
    logz = jax.nn.logsumexp(aug, axis=-1)
    tgt = jnp.take_along_axis(aug, labels[:, None], axis=1)[:, 0]
    return jnp.mean(logz - tgt)


if __name__ == "__main__":
    key = jax.random.PRNGKey(0)
    N, C, A = 12, 10, 32          # batch (not a tile multiple -> exercises masking), classes, feat dim
    k1, k2, k3, k4 = jax.random.split(key, 4)

    features = jax.random.normal(k1, (N, A), jnp.float32)
    weight = 0.1 * jax.random.normal(k2, (C, A), jnp.float32)    # deterministic fc weight
    pred = features @ weight.T                                   # classifier logits (N, C)
    labels = jax.random.randint(k3, (N,), 0, C, jnp.int32)
    base = 0.1 * jax.random.normal(k4, (C, A, A), jnp.float32)
    cv = jnp.einsum('cab,cdb->cad', base, base)                  # symmetric PSD covariances
    Lambda = 0.5

    # tile_b=8 only because the demo batch is tiny; real workloads use the 512 default.
    loss = pcfea_loss_no_mean(weight, features, pred, labels, Lambda, cv, tile_b=8)
    loss = jax.block_until_ready(loss)

    ref = _ref_loss(weight, features, pred, labels, Lambda, cv)
    assert jnp.allclose(loss, ref, atol=1e-4, rtol=1e-4), (loss, ref)
    print("KERNEL_OK")
</pallas_src>

<mosaic_0001>
module attributes {stable_mosaic.version = 11 : i64} {
  func.func @_sigma_kernel(%arg0: i32, %arg1: memref<10x32xf32, #tpu.memory_space<vmem>>, %arg2: memref<10x32xf32, #tpu.memory_space<vmem>>, %arg3: memref<10x32x32xf32, #tpu.memory_space<vmem>>, %arg4: memref<10x10xf32, #tpu.memory_space<vmem>>) attributes {dimension_semantics = [#tpu.dimension_semantics<parallel>], iteration_bounds = array<i64: 1>, scalar_prefetch = 0 : i64, scratch_operands = 0 : i64, tpu.core_type = #tpu.core_type<tc>, window_params = [{pipeline_mode = #tpu.pipeline_mode<synchronous>, transform_indices = @transform_0, window_bounds = array<i64: 10, 32>}, {transform_indices = @transform_1, window_bounds = array<i64: 10, 32>}, {transform_indices = @transform_2, window_bounds = array<i64: 10, 32, 32>}, {transform_indices = @transform_3, window_bounds = array<i64: 10, 10>}]} {
    %c0 = arith.constant 0 : index
    %c0_0 = arith.constant 0 : index
    %0 = vector.load %arg1[%c0, %c0_0] : memref<10x32xf32, #tpu.memory_space<vmem>>, vector<10x32xf32>
    %c0_1 = arith.constant 0 : index
    %c0_2 = arith.constant 0 : index
    %1 = vector.load %arg2[%c0_1, %c0_2] : memref<10x32xf32, #tpu.memory_space<vmem>>, vector<10x32xf32>
    %c0_3 = arith.constant 0 : index
    %c0_4 = arith.constant 0 : index
    %c0_5 = arith.constant 0 : index
    %2 = vector.load %arg3[%c0_3, %c0_4, %c0_5] : memref<10x32x32xf32, #tpu.memory_space<vmem>>, vector<10x32x32xf32>
    %3 = vector.shape_cast %0 : vector<10x32xf32> to vector<1x10x32xf32>
    %4 = vector.shape_cast %1 : vector<10x32xf32> to vector<10x1x32xf32>
    %5 = vector.broadcast %3 : vector<1x10x32xf32> to vector<10x10x32xf32>
    %6 = vector.broadcast %4 : vector<10x1x32xf32> to vector<10x10x32xf32>
    %7 = arith.subf %5, %6 : vector<10x10x32xf32>
    %cst = arith.constant dense<0.000000e+00> : vector<10x10x32xf32>
    %8 = tpu.matmul %7, %2, %cst {dimension_numbers = #tpu.dot_dimension_numbers<[2], [1], [1], [2], [0, 0, 0, 1, 1, 2], [0], [0]>, precision = #tpu.contract_precision<fp32>} : vector<10x10x32xf32>, vector<10x32x32xf32>, vector<10x10x32xf32> -> vector<10x10x32xf32>
    %9 = arith.mulf %8, %7 : vector<10x10x32xf32>
    %cst_6 = arith.constant dense<0.000000e+00> : vector<10x10xf32>
    %10 = vector.multi_reduction <add>, %9, %cst_6 [2] : vector<10x10x32xf32> to vector<10x10xf32>
    %cst_7 = arith.constant 2.500000e-01 : f32
    %11 = vector.broadcast %cst_7 : f32 to vector<10x10xf32>
    %12 = arith.mulf %11, %10 : vector<10x10xf32>
    %c0_8 = arith.constant 0 : index
    %c0_9 = arith.constant 0 : index
    %13 = vector.load %arg4[%c0_8, %c0_9] : memref<10x10xf32, #tpu.memory_space<vmem>>, vector<10x10xf32>
    tpu.vector_store %arg4[%c0_8, %c0_9], %12 {strides = array<i32>} : memref<10x10xf32, #tpu.memory_space<vmem>>, vector<10x10xf32>,
    return
  }
  func.func @transform_0(%arg0: i32) -> (i32, i32) {
    %c0_i32 = arith.constant 0 : i32
    %c0_i32_0 = arith.constant 0 : i32
    %c0_i32_1 = arith.constant 0 : i32
    return %c0_i32, %c0_i32_0 : i32, i32
  }
  func.func @transform_1(%arg0: i32) -> (i32, i32) {
    %c0_i32 = arith.constant 0 : i32
    %c0_i32_0 = arith.constant 0 : i32
    return %arg0, %c0_i32 : i32, i32
  }
  func.func @transform_2(%arg0: i32) -> (i32, i32, i32) {
    %c0_i32 = arith.constant 0 : i32
    %c0_i32_0 = arith.constant 0 : i32
    %c0_i32_1 = arith.constant 0 : i32
    return %arg0, %c0_i32, %c0_i32_0 : i32, i32, i32
  }
  func.func @transform_3(%arg0: i32) -> (i32, i32) {
    %c0_i32 = arith.constant 0 : i32
    %c0_i32_0 = arith.constant 0 : i32
    return %arg0, %c0_i32 : i32, i32
  }
}

</mosaic_0001>

<bundles_post_ra>
// kernel: tpu_custom_call.1
= control target key start
LH: loop header
LB: loop body
LE: loop exit
PB: predicated region body
PF: predicated region fallthrough
CT: control target
= control target key end

     0   :  { %8 = vsyncpa [#allocation3], 0  ;;  %s3731_s0 = inlined_call_operand.hbm [shape: f32[10,32], index: 0, kind: input, shape index: {}]   ;;  %s3732_s1 = inlined_call_operand.hbm [shape: f32[10,32], index: 1, kind: input, shape index: {}]   ;;  %s3733_s2 = inlined_call_operand.hbm [shape: f32[10,32,32], index: 2, kind: input, shape index: {}]   ;;  %s3734_s3 = inlined_call_operand.hbm [shape: f32[10,10], index: 3, kind: output, shape index: {}]  }
   0x1   :  { %9 = vsyncpa [#allocation6], 0 }
   0x2   :  { %10 = vsyncpa [#allocation4], 0  ;;  %s28_s14 = sshll.u32 %s3732_s1, 4  ;;  %s2683_s15 = smov [#allocation5]   ;;  %s29_s14 = int_to_ptr.hbm [resolvable:$true] %s28_s14 }
   0x3   :  { %s30_s16 = sshll.u32 %s2683_s15, 4  ;;  %s15_s19 = sshll.u32 %s3731_s0, 4  ;;  %s31_s16 = int_to_ptr.vmem [resolvable:$true] %s30_s16  ;;  %s16_s19 = int_to_ptr.hbm [resolvable:$true] %s15_s19 }
   0x4   :  { %s2684_s20 = smov 128   ;;  %s2685_s21 = smov 8  }
   0x5   :  { %36 = dma.hbm_to_vmem [thread:$0]  %s29_s14, 256, %s31_s16, [#allocation6], %s2684_s20, %s2684_s20, %s2685_s21  }
   0x6   :  { %s2686_s22 = smov [#allocation2]   ;;  %s41_s1 = sshll.u32 %s3733_s2, 4  ;;  %s42_s1 = int_to_ptr.hbm [resolvable:$true] %s41_s1 }
   0x7   :  { %s17_s23 = sshll.u32 %s2686_s22, 4  ;;  %s2687_s0 = smov [#allocation7]   ;;  %s18_s23 = int_to_ptr.vmem [resolvable:$true] %s17_s23 }
   0x8   :  { %23 = dma.hbm_to_vmem [thread:$0]  %s16_s19, 256, %s18_s23, [#allocation3], %s2684_s20, %s2684_s20, %s2685_s21  }
   0x9   :  { %s43_s26 = sshll.u32 %s2687_s0, 4  ;;  %s44_s26 = int_to_ptr.vmem [resolvable:$true] %s43_s26 }
   0xa   :  { %49 = dma.hbm_to_vmem [thread:$0]  %s42_s1, 5120, %s44_s26, [#allocation6], %s2684_s20, %s2684_s20, %s2685_s21  }
   0xb   :  { %2677 = dma.done.wait [#allocation3], 256  }
   0xc   :  { %2678 = vsyncadd [#allocation3], 4294967040 }
   0xd   :  { %2679 = dma.done.wait [#allocation6], 5376  }
   0xe   :  { %2680 = vsyncadd [#allocation6], 4294961920  ;;  %v69_v0 = vld [vmem:[#allocation7 + $0x18] sm:$0xff]  ;;  %v68_v1 = vld [vmem:[#allocation7 + $0x10] sm:$0xff]  ;;  %vm156_vm0 = vcmask 261120   ;;  %vm2400_vm1 = vcmask 254976  }
   0xf   :  { %v67_v2 = vld [vmem:[#allocation7 + $0x8] sm:$0xff]  ;;  %v2727_v3 = vand.u32 4294901760, %v69_v0  ;;  %v2729_v4 = vand.u32 4294901760, %v68_v1  ;;  %v66_v6 = vld [vmem:[#allocation7] sm:$0xff]  ;;  %v2735_v8 = vld [vmem:[#allocation5] sm:$0xff]  ;;  %vm2503_vm2 = vcmask 130112  }
  0x10   :  { %v2731_v5 = vand.u32 4294901760, %v67_v2  ;;  %v2733_v7 = vld [vmem:[#allocation2] sm:$0xff]  ;;  %v2737_v9 = vand.u32 4294901760, %v66_v6  ;;  %v116_v10 = vperm.slane %v2735_v8, 0  ;;  %v73_v11 = vld [vmem:[#allocation7 + $0x38] sm:$0xff]  ;;  %v72_v12 = vld [vmem:[#allocation7 + $0x30] sm:$0xff] }
  0x11   :  { %v2740_v13 = vld [vmem:[#allocation2 + $0x8] sm:$0x3]  ;;  %v213_v14 = vsub.f32 %v69_v0, %v2727_v3  ;;  %293 = vmatpush.msra.mxu3 %v2727_v3  ;;  %176 = vmatpush.msra.mxu0 %v2727_v3  ;;  %v2746_v15 = vsub.f32 %v68_v1, %v2729_v4  ;;  %v2751_v17 = vand.u32 4294901760, %v73_v11  ;;  %v2759_v20 = vand.u32 4294901760, %v72_v12  ;;  %v70_v39 = vld [vmem:[#allocation7 + $0x20] sm:$0xff]  ;;  %v77_v63 = vld [vmem:[#allocation7 + $0x58] sm:$0xff] }
  0x12   :  { %v2749_v16 = vsub.f32 %v67_v2, %v2731_v5  ;;  %v2754_v18 = vsub.f32 %v66_v6, %v2737_v9  ;;  %v2757_v19 = vsub.f32 %v2733_v7, %v116_v10  ;;  %v2762_v21 = vsub.f32 %v2740_v13, %v116_v10  ;;  %v71_v38 = vld [vmem:[#allocation7 + $0x28] sm:$0xff]  ;;  %s2688_s2 = smov [#allocation8]   ;;  %s2559_s30 = sshll.u32 %s3734_s3, 4  ;;  %s2560_s30 = int_to_ptr.hbm [resolvable:$true] %s2559_s30 }
  0x13   :  { %259 = vmatpush.msra.mxu2 %v213_v14  ;;  %295 = vmatpush.msra.mxu3 %v2729_v4  ;;  %v214_v22 = vand.u32 4294901760, %v213_v14  ;;  %v220_v23 = vand.u32 4294901760, %v2746_v15  ;;  %v2768_v25 = vsub.f32 %v73_v11, %v2751_v17  ;;  %v2775_v28 = vsub.f32 %v72_v12, %v2759_v20  ;;  %s2557_s27 = sshll.u32 %s2688_s2, 4  ;;  %s2558_s27 = int_to_ptr.vmem [resolvable:$true] %s2557_s27 }
  0x14   :  { %v226_v24 = vand.u32 4294901760, %v2749_v16  ;;  %178 = vmatpush.msra.mxu0 %v2729_v4  ;;  %v158_v26 = vsel %vm156_vm0, %v2757_v19, 0  ;;  %v232_v27 = vand.u32 4294901760, %v2754_v18  ;;  %v161_v29 = vsel %vm156_vm0, %v2762_v21, 0 }
  0x15   :  { %262 = vmatpush.msra.mxu2 %v2746_v15  ;;  %v215_v30 = vsub.f32 %v213_v14, %v214_v22  ;;  %297 = vmatpush.msra.mxu3 %v2731_v5  ;;  %v221_v31 = vsub.f32 %v2746_v15, %v220_v23  ;;  %v2782_v32 = vand.u32 4294901760, %v158_v26  ;;  %v436_v34 = vand.u32 4294901760, %v2768_v25  ;;  %v76_v15 = vld [vmem:[#allocation7 + $0x50] sm:$0xff] }
  0x16   :  { %v227_v33 = vsub.f32 %v2749_v16, %v226_v24  ;;  %180 = vmatpush.msra.mxu0 %v2731_v5  ;;  %v233_v35 = vsub.f32 %v2754_v18, %v232_v27  ;;  %v442_v36 = vand.u32 4294901760, %v2775_v28  ;;  %v2793_v37 = vand.u32 4294901760, %v161_v29 }
  0x17   :  { %v216_v40 = vand.u32 4294901760, %v215_v30  ;;  %265 = vmatpush.msra.mxu2 %v2749_v16  ;;  %v222_v41 = vand.u32 4294901760, %v221_v31  ;;  %299 = vmatpush.msra.mxu3 %v2737_v9  ;;  %v184_v42 = vsub.f32 %v158_v26, %v2782_v32  ;;  %v437_v44 = vsub.f32 %v2768_v25, %v436_v34 }
  0x18   :  { %182 = vmatpush.msra.mxu0 %v2737_v9  ;;  %v228_v43 = vand.u32 4294901760, %v227_v33  ;;  %v443_v45 = vsub.f32 %v2775_v28, %v442_v36  ;;  %v192_v46 = vsub.f32 %v161_v29, %v2793_v37  ;;  %v2807_v48 = vand.u32 4294901760, %v71_v38 }
  0x19   :  { %217 = vmatpush.msra.mxu1 %v216_v40  ;;  %268 = vmatpush.msra.mxu2 %v2754_v18  ;;  %v185_v47 = vand.u32 4294901760, %v184_v42  ;;  %v2809_v49 = vand.u32 4294901760, %v70_v39  ;;  %v108_v50 = vrot.slane %v2735_v8, 1  ;;  %v438_v51 = vand.u32 4294901760, %v437_v44 }
  0x1a   :  { %271 = vmatmul.f32.vlgmr.msra.gmra.mxu2 %v184_v42  ;;  %328 = vmatpush.msrb.mxu0 %v214_v22  ;;  %v234_v52 = vand.u32 4294901760, %v233_v35  ;;  %v444_v53 = vand.u32 4294901760, %v443_v45  ;;  %v193_v54 = vand.u32 4294901760, %v192_v46  ;;  %v2813_v56 = vsub.f32 %v71_v38, %v2807_v48 }
  0x1b   :  { %223 = vmatpush.msra.mxu1 %v222_v41  ;;  %303 = vmatmul.f32.vlgmr.msra.gmra.mxu3 %v185_v47  ;;  %v186_v55 = vsub.f32 %v184_v42, %v185_v47  ;;  %v2816_v57 = vsub.f32 %v70_v39, %v2809_v49  ;;  %v117_v58 = vperm.slane %v108_v50, 0  ;;  %v2842_v14 = vand.u32 4294901760, %v77_v63  ;;  %v81_v41 = vld [vmem:[#allocation7 + $0x78] sm:$0xff]  ;;  %v79_v50 = vld [vmem:[#allocation7 + $0x68] sm:$0xff] }
  0x1c   :  { %398 = vmatpush.msrb.mxu2 %v2751_v17  ;;  %439 = vmatpush.msrb.mxu3 %v438_v51  ;;  %v448_v60 = vand.u32 4294901760, %v2813_v56  ;;  %v194_v1 = vsub.f32 %v192_v46, %v193_v54  ;;  %v2852_v30 = vand.u32 4294901760, %v76_v15  ;;  %v2905_v44 = vand.u32 4294901760, %v81_v41 }
  0x1d   :  { %229 = vmatpush.msra.mxu1 %v228_v43  ;;  %v187_v59 = vand.u32 4294901760, %v186_v55  ;;  %332 = vmatpush.msrb.mxu0 %v220_v23  ;;  %v454_v61 = vand.u32 4294901760, %v2816_v57  ;;  %v2822_v62 = vsub.f32 %v2733_v7, %v117_v58  ;;  %v2826_v0 = vsub.f32 %v2740_v13, %v117_v58 }
  0x1e   :  { %400 = vmatpush.msrb.mxu2 %v2759_v20  ;;  %445 = vmatpush.msrb.mxu3 %v444_v53  ;;  %v449_v2 = vsub.f32 %v2813_v56, %v448_v60  ;;  %v195_v31 = vand.u32 4294901760, %v194_v1  ;;  %v2875_v40 = vsub.f32 %v76_v15, %v2852_v30  ;;  %v109_v43 = vrot.slane %v2735_v8, 2 }
  0x1f   :  { %188 = vmatmul.f32.vlgmr.msra.gmra.mxu0 %v187_v59  ;;  %235 = vmatpush.msra.mxu1 %v234_v52  ;;  %v455_v6 = vsub.f32 %v2816_v57, %v454_v61  ;;  %v380_v10 = vsel %vm156_vm0, %v2822_v62, 0  ;;  %v383_v12 = vsel %vm156_vm0, %v2826_v0, 0  ;;  %vm2532_vm3 = vcmask 1041409  }
  0x20   :  { %237 = vmatmul.f32.vlgmr.msra.gmra.mxu1 %v2782_v32  ;;  %402 = vmatpush.msrb.mxu2 %v2807_v48  ;;  %v2838_v11 = vand.u32 4294901760, %v380_v10  ;;  %v450_v22 = vand.u32 4294901760, %v449_v2  ;;  %v2847_v23 = vand.u32 4294901760, %v383_v12  ;;  %v118_v52 = vperm.slane %v109_v43, 0 }
  0x21   :  { %363 = vmatpush.msrb.mxu1 %v2727_v3  ;;  %336 = vmatpush.msrb.mxu0 %v226_v24  ;;  %v456_v26 = vand.u32 4294901760, %v455_v6  ;;  %v75_v3 = vld [vmem:[#allocation7 + $0x48] sm:$0xff]  ;;  %v2861_v24 = vsub.f32 %v77_v63, %v2842_v14  ;;  %v110_v6 = vrot.slane %v2735_v8, 3  ;;  %vm2534_vm4 = vcmask 1042434  }
  0x22   :  { %276 = vmatmul.f32.gmra.mxu2 %v192_v46  ;;  %v2850_v29 = vsub.f32 %v380_v10, %v2838_v11  ;;  %v2856_v33 = vsub.f32 %v383_v12, %v2847_v23  ;;  %451 = vmatpush.msrb.mxu3 %v450_v22  ;;  %v2866_v35 = vand.u32 4294901760, %v75_v3  ;;  %v2917_v46 = vsub.f32 %v81_v41, %v2905_v44 }
  0x23   :  { %309 = vmatmul.f32.gmra.mxu3 %v193_v54  ;;  %365 = vmatpush.msrb.mxu1 %v2729_v4  ;;  %v74_v4 = vld [vmem:[#allocation7 + $0x40] sm:$0xff]  ;;  %v658_v18 = vand.u32 4294901760, %v2861_v24  ;;  %v2948_v59 = vsub.f32 %v2733_v7, %v118_v52  ;;  %vm2536_vm5 = vcmask 1043459   ;;  %vm2538_vm6 = vcmask 1044484  }
  0x24   :  { %404 = vmatpush.msrb.mxu2 %v2809_v49  ;;  %v407_v16 = vand.u32 4294901760, %v2850_v29  ;;  %340 = vmatpush.msrb.mxu0 %v232_v27  ;;  %v415_v39 = vand.u32 4294901760, %v2856_v33  ;;  %v2881_v27 = vand.u32 4294901760, %v74_v4  ;;  %v880_v54 = vand.u32 4294901760, %v2917_v46 }
  0x25   :  { %367 = vmatpush.msrb.mxu1 %v2731_v5  ;;  %457 = vmatpush.msrb.mxu3 %v456_v26  ;;  %v602_v12 = vsel %vm156_vm0, %v2948_v59, 0  ;;  %vm2540_vm7 = vcmask 1045509   ;;  %vm2542_vm8 = vcmask 1046534   ;;  %vm2544_vm9 = vcmask 1047559  }
  0x26   :  { %v408_v38 = vsub.f32 %v2850_v29, %v407_v16  ;;  %550 = vmatpush.msra.mxu2 %v436_v34  ;;  %481 = vmatpush.msra.mxu0 %v2768_v25  ;;  %v2886_v34 = vsub.f32 %v75_v3, %v2866_v35  ;;  %v664_v25 = vand.u32 4294901760, %v2875_v40  ;;  %v2902_v42 = vsub.f32 %v74_v4, %v2881_v27 }
  0x27   :  { %196 = vmatmul.f32.gmra.mxu0 %v195_v31  ;;  %369 = vmatpush.msrb.mxu1 %v2737_v9  ;;  %v416_v9 = vsub.f32 %v2856_v33, %v415_v39  ;;  %v119_v3 = vperm.slane %v110_v6, 0  ;;  %v2984_v4 = vsub.f32 %v2740_v13, %v118_v52  ;;  %v83_v52 = vld [vmem:[#allocation7 + $0x88] sm:$0xff]  ;;  %v89_v6 = vld [vmem:[#allocation7 + $0xb8] sm:$0xff]  ;;  %vm2549_vm10 = vcmask 80896  }
  0x28   :  { %241 = vmatmul.f32.gmra.mxu1 %v2793_v37  ;;  %v409_v5 = vand.u32 4294901760, %v408_v38  ;;  %585 = vmatpush.msra.mxu3 %v2751_v17  ;;  %v665_v45 = vsub.f32 %v2875_v40, %v664_v25  ;;  %v676_v51 = vand.u32 4294901760, %v2902_v42  ;;  %vm2551_vm11 = vcmask 74752  }
  0x29   :  { %515 = vmatpush.msra.mxu1 %v2751_v17  ;;  %484 = vmatpush.msra.mxu0 %v2775_v28  ;;  %v659_v17 = vsub.f32 %v2861_v24, %v658_v18  ;;  %v670_v28 = vand.u32 4294901760, %v2886_v34  ;;  %v2997_v41 = vsub.f32 %v2733_v7, %v119_v3 }
  0x2a   :  { %410 = vmatmul.f32.vlgmr.msrb.gmra.mxu2 %v409_v5  ;;  %587 = vmatpush.msra.mxu3 %v2759_v20  ;;  %v677_v58 = vsub.f32 %v2902_v42, %v676_v51 }
  0x2b   :  { %459 = vmatmul.f32.vlgmr.msrb.gmra.mxu3 %v2838_v11  ;;  %554 = vmatpush.msra.mxu2 %v442_v36  ;;  %v80_v36 = vld [vmem:[#allocation7 + $0x70] sm:$0xff]  ;;  %v671_v53 = vsub.f32 %v2886_v34, %v670_v28 }
  0x2c   :  { %517 = vmatpush.msra.mxu1 %v2759_v20  ;;  %487 = vmatpush.msra.mxu0 %v2813_v56  ;;  %v417_v20 = vand.u32 4294901760, %v416_v9  ;;  %v2919_v47 = vand.u32 4294901760, %v80_v36  ;;  %v78_v56 = vld [vmem:[#allocation7 + $0x60] sm:$0xff]  ;;  %v678_v10 = vand.u32 4294901760, %v677_v58 }
  0x2d   :  { %558 = vmatpush.msra.mxu2 %v448_v60  ;;  %589 = vmatpush.msra.mxu3 %v2807_v48  ;;  %v672_v60 = vand.u32 4294901760, %v671_v53  ;;  %v3073_v53 = vand.u32 4294901760, %v83_v52 }
  0x2e   :  { %519 = vmatpush.msra.mxu1 %v2807_v48  ;;  %490 = vmatpush.msra.mxu0 %v2816_v57  ;;  %v660_v48 = vand.u32 4294901760, %v659_v17  ;;  %v2934_v55 = vsub.f32 %v80_v36, %v2919_v47  ;;  %v666_v57 = vand.u32 4294901760, %v665_v45  ;;  %v605_v17 = vsel %vm156_vm0, %v2984_v4, 0 }
  0x2f   :  { %342 = vmatmul.f32.vlgmr.msrb.gmra.mxu0 %v2782_v32  ;;  %562 = vmatpush.msra.mxu2 %v454_v61  ;;  %v881_v61 = vsub.f32 %v2917_v46, %v880_v54 }
  0x30   :  { %371 = vmatmul.f32.vlgmr.msrb.gmra.mxu1 %v2782_v32  ;;  %591 = vmatpush.msra.mxu3 %v2809_v49  ;;  %v2936_v32 = vand.u32 4294901760, %v79_v50  ;;  %v886_v63 = vand.u32 4294901760, %v2934_v55 }
  0x31   :  { %521 = vmatpush.msra.mxu1 %v2809_v49  ;;  %620 = vmatpush.msrb.mxu0 %v2842_v14  ;;  %v2941_v49 = vand.u32 4294901760, %v78_v56  ;;  %v882_v15 = vand.u32 4294901760, %v881_v61 }
  0x32   :  { %418 = vmatmul.f32.gmra.mxu2 %v417_v20  ;;  %737 = vmatpush.msrb.mxu3 %v2842_v14  ;;  %v2957_v1 = vsub.f32 %v79_v50, %v2936_v32  ;;  %v887_v22 = vsub.f32 %v2934_v55, %v886_v63  ;;  %v84_v20 = vld [vmem:[#allocation7 + $0x90] sm:$0xff] }
  0x33   :  { %463 = vmatmul.f32.gmra.mxu3 %v2847_v23  ;;  %703 = vmatpush.msrb.mxu2 %v2861_v24  ;;  %v2963_v2 = vsub.f32 %v78_v56, %v2941_v49  ;;  %v824_v24 = vsel %vm156_vm0, %v2997_v41, 0  ;;  %v3057_v50 = vand.u32 4294901760, %v84_v20 }
  0x34   :  { %661 = vmatpush.msrb.mxu1 %v660_v48  ;;  %622 = vmatpush.msrb.mxu0 %v2852_v30  ;;  %v892_v26 = vand.u32 4294901760, %v2957_v1  ;;  %v888_v38 = vand.u32 4294901760, %v887_v22 }
  0x35   :  { %706 = vmatpush.msrb.mxu2 %v2875_v40  ;;  %739 = vmatpush.msrb.mxu3 %v2852_v30  ;;  %v898_v31 = vand.u32 4294901760, %v2963_v2  ;;  %v3027_v40 = vsub.f32 %v2740_v13, %v119_v3 }
  0x36   :  { %667 = vmatpush.msrb.mxu1 %v666_v57  ;;  %624 = vmatpush.msrb.mxu0 %v2866_v35  ;;  %v3081_v57 = vsub.f32 %v83_v52, %v3073_v53 }
  0x37   :  { %346 = vmatmul.f32.gmra.mxu0 %v2793_v37  ;;  %709 = vmatpush.msrb.mxu2 %v2886_v34  ;;  %v899_v9 = vsub.f32 %v2963_v2, %v898_v31 }
  0x38   :  { %375 = vmatmul.f32.gmra.mxu1 %v2793_v37  ;;  %741 = vmatpush.msrb.mxu3 %v2866_v35  ;;  %v2979_v37 = vand.u32 4294901760, %v602_v12 }
  0x39   :  { %673 = vmatpush.msrb.mxu1 %v672_v60  ;;  %626 = vmatpush.msrb.mxu0 %v2881_v27 }
  0x3a   :  { %564 = vmatmul.f32.vlgmr.msra.gmra.mxu2 %v2838_v11  ;;  %743 = vmatpush.msrb.mxu3 %v2881_v27  ;;  %v628_v5 = vsub.f32 %v602_v12, %v2979_v37  ;;  %v3106_v12 = vand.u32 4294901760, %v89_v6 }
  0x3b   :  { %593 = vmatmul.f32.vlgmr.msra.gmra.mxu3 %v2838_v11  ;;  %712 = vmatpush.msrb.mxu2 %v2902_v42  ;;  %v893_v11 = vsub.f32 %v2957_v1, %v892_v26  ;;  %v85_v42 = vld [vmem:[#allocation7 + $0x98] sm:$0xff] }
  0x3c   :  { %679 = vmatpush.msrb.mxu1 %v678_v10  ;;  %883 = vmatpush.msra.mxu3 %v882_v15  ;;  %v629_v36 = vand.u32 4294901760, %v628_v5  ;;  %v111_v10 = vrot.slane %v2735_v8, 4  ;;  %v3114_v3 = vsub.f32 %v89_v6, %v3106_v12 }
  0x3d   :  { %842 = vmatpush.msra.mxu2 %v2905_v44  ;;  %v894_v43 = vand.u32 4294901760, %v893_v11 }
  0x3e   :  { %889 = vmatpush.msra.mxu3 %v888_v38 }
  0x3f   :  { %493 = vmatmul.f32.vlgmr.msra.gmra.mxu0 %v2850_v29  ;;  %844 = vmatpush.msra.mxu2 %v2919_v47  ;;  %v3010_v29 = vand.u32 4294901760, %v605_v17 }
  0x40   :  { %525 = vmatmul.f32.vlgmr.msra.gmra.mxu1 %v407_v16  ;;  %772 = vmatpush.msra.mxu0 %v658_v18  ;;  %v900_v16 = vand.u32 4294901760, %v899_v9  ;;  %v87_v9 = vld [vmem:[#allocation7 + $0xa8] sm:$0xff] }
  0x41   :  { %807 = vmatpush.msra.mxu1 %v2842_v14  ;;  %846 = vmatpush.msra.mxu2 %v2936_v32  ;;  %v3022_v14 = vand.u32 4294901760, %v824_v24 }
  0x42   :  { %568 = vmatmul.f32.gmra.mxu2 %v2847_v23  ;;  %776 = vmatpush.msra.mxu0 %v664_v25  ;;  %v827_v25 = vsel %vm156_vm0, %v3027_v40, 0 }
  0x43   :  { %597 = vmatmul.f32.gmra.mxu3 %v2847_v23  ;;  %809 = vmatpush.msra.mxu1 %v2852_v30  ;;  %v630_v23 = vsub.f32 %v628_v5, %v629_v36  ;;  %v636_v30 = vsub.f32 %v605_v17, %v3010_v29  ;;  %v120_v17 = vperm.slane %v111_v10, 0 }
  0x44   :  { %780 = vmatpush.msra.mxu0 %v670_v28  ;;  %895 = vmatpush.msra.mxu3 %v894_v43  ;;  %v1324_v43 = vand.u32 4294901760, %v3114_v3 }
  0x45   :  { %811 = vmatpush.msra.mxu1 %v2866_v35  ;;  %848 = vmatpush.msra.mxu2 %v2941_v49  ;;  %v3033_v35 = vsub.f32 %v824_v24, %v3022_v14  ;;  %v631_v18 = vand.u32 4294901760, %v630_v23  ;;  %v637_v34 = vand.u32 4294901760, %v636_v30  ;;  %v86_v23 = vld [vmem:[#allocation7 + $0xa0] sm:$0xff]  ;;  %v3172_v6 = vsub.f32 %v2740_v13, %v120_v17 }
  0x46   :  { %784 = vmatpush.msra.mxu0 %v676_v51  ;;  %901 = vmatpush.msra.mxu3 %v900_v16  ;;  %v3129_v16 = vand.u32 4294901760, %v87_v9 }
  0x47   :  { %498 = vmatmul.f32.gmra.mxu0 %v2856_v33  ;;  %813 = vmatpush.msra.mxu1 %v2881_v27  ;;  %v3042_v33 = vand.u32 4294901760, %v85_v42  ;;  %v3046_v27 = vand.u32 4294901760, %v827_v25  ;;  %v638_v28 = vsub.f32 %v636_v30, %v637_v34 }
  0x48   :  { %531 = vmatmul.f32.gmra.mxu1 %v415_v39  ;;  %v851_v39 = vand.u32 4294901760, %v3033_v35 }
  0x49   :  { %v3055_v45 = vsub.f32 %v85_v42, %v3042_v33  ;;  %v3064_v51 = vsub.f32 %v827_v25, %v3046_v27  ;;  %v3143_v25 = vsub.f32 %v2733_v7, %v120_v17  ;;  %v1325_v42 = vsub.f32 %v3114_v3, %v1324_v43 }
  0x4a   :  { %715 = vmatmul.f32.vlgmr.msrb.gmra.mxu2 %v628_v5  ;;  %v852_v48 = vsub.f32 %v3033_v35, %v851_v39 }
  0x4b   :  { %747 = vmatmul.f32.vlgmr.msrb.gmra.mxu3 %v629_v36  ;;  %994 = vmatpush.msrb.mxu2 %v880_v54  ;;  %v1102_v54 = vand.u32 4294901760, %v3055_v45  ;;  %v1046_v52 = vsel %vm156_vm0, %v3143_v25, 0 }
  0x4c   :  { %1029 = vmatpush.msrb.mxu3 %v2905_v44  ;;  %v853_v56 = vand.u32 4294901760, %v852_v48 }
  0x4d   :  { %998 = vmatpush.msrb.mxu2 %v886_v63  ;;  %v1103_v61 = vsub.f32 %v3055_v45, %v1102_v54  ;;  %v1114_v63 = vand.u32 4294901760, %v3081_v57 }
  0x4e   :  { %1031 = vmatpush.msrb.mxu3 %v2919_v47 }
  0x4f   :  { %632 = vmatmul.f32.vlgmr.msrb.gmra.mxu0 %v631_v18  ;;  %1002 = vmatpush.msrb.mxu2 %v892_v26  ;;  %v1104_v15 = vand.u32 4294901760, %v1103_v61  ;;  %v1115_v22 = vsub.f32 %v3081_v57, %v1114_v63  ;;  %v88_v26 = vld [vmem:[#allocation7 + $0xb0] sm:$0xff]  ;;  %v3137_v18 = vand.u32 4294901760, %v86_v23 }
  0x50   :  { %681 = vmatmul.f32.vlgmr.msrb.gmra.mxu1 %v2979_v37  ;;  %925 = vmatpush.msrb.mxu0 %v2917_v46  ;;  %v639_v46 = vand.u32 4294901760, %v638_v28  ;;  %v3116_v38 = vand.u32 4294901760, %v88_v26 }
  0x51   :  { %959 = vmatpush.msrb.mxu1 %v2905_v44  ;;  %1033 = vmatpush.msrb.mxu3 %v2936_v32  ;;  %v3068_v44 = vsub.f32 %v84_v20, %v3057_v50  ;;  %v1116_v24 = vand.u32 4294901760, %v1115_v22  ;;  %v3151_v20 = vsub.f32 %v86_v23, %v3137_v18  ;;  %v90_v23 = vld [vmem:[#allocation7 + $0xc0] sm:$0xff] }
  0x52   :  { %720 = vmatmul.f32.gmra.mxu2 %v636_v30  ;;  %928 = vmatpush.msrb.mxu0 %v2934_v55  ;;  %v82_v55 = vld [vmem:[#allocation7 + $0x80] sm:$0xff]  ;;  %v3127_v36 = vsub.f32 %v88_v26, %v3116_v38  ;;  %v3135_v30 = vsub.f32 %v87_v9, %v3129_v16  ;;  %v1049_v26 = vsel %vm156_vm0, %v3172_v6, 0 }
  0x53   :  { %753 = vmatmul.f32.gmra.mxu3 %v637_v34  ;;  %961 = vmatpush.msrb.mxu1 %v2919_v47  ;;  %v859_v47 = vand.u32 4294901760, %v3064_v51  ;;  %v3083_v58 = vand.u32 4294901760, %v82_v55  ;;  %v1342_v61 = vand.u32 4294901760, %v3151_v20 }
  0x54   :  { %931 = vmatpush.msrb.mxu0 %v2957_v1  ;;  %1006 = vmatpush.msrb.mxu2 %v898_v31  ;;  %v1336_v28 = vand.u32 4294901760, %v3135_v30 }
  0x55   :  { %963 = vmatpush.msrb.mxu1 %v2936_v32  ;;  %1035 = vmatpush.msrb.mxu3 %v2941_v49  ;;  %v1108_v32 = vand.u32 4294901760, %v3068_v44  ;;  %v3089_v60 = vsub.f32 %v82_v55, %v3083_v58  ;;  %v860_v1 = vsub.f32 %v3064_v51, %v859_v47  ;;  %v1326_v55 = vand.u32 4294901760, %v1325_v42 }
  0x56   :  { %934 = vmatpush.msrb.mxu0 %v2963_v2 }
  0x57   :  { %640 = vmatmul.f32.gmra.mxu0 %v639_v46  ;;  %965 = vmatpush.msrb.mxu1 %v2941_v49  ;;  %v1109_v49 = vsub.f32 %v3068_v44, %v1108_v32  ;;  %v1120_v2 = vand.u32 4294901760, %v3089_v60  ;;  %v861_v31 = vand.u32 4294901760, %v860_v1  ;;  %v112_v46 = vrot.slane %v2735_v8, 5 }
  0x58   :  { %685 = vmatmul.f32.gmra.mxu1 %v3010_v29 }
  0x59   :  { %v1110_v11 = vand.u32 4294901760, %v1109_v49  ;;  %v1121_v5 = vsub.f32 %v3089_v60, %v1120_v2  ;;  %v3168_v49 = vand.u32 4294901760, %v1046_v52 }
  0x5a   :  { %854 = vmatmul.f32.vlgmr.msra.gmra.mxu2 %v853_v56  ;;  %v1337_v56 = vsub.f32 %v3135_v30, %v1336_v28 }
  0x5b   :  { %903 = vmatmul.f32.vlgmr.msra.gmra.mxu3 %v3022_v14  ;;  %1147 = vmatpush.msra.mxu2 %v3055_v45  ;;  %v1122_v34 = vand.u32 4294901760, %v1121_v5 }
  0x5c   :  { %1181 = vmatpush.msra.mxu3 %v3042_v33  ;;  %v1338_v10 = vand.u32 4294901760, %v1337_v56 }
  0x5d   :  { %1150 = vmatpush.msra.mxu2 %v3068_v44 }
  0x5e   :  { %1183 = vmatpush.msra.mxu3 %v3057_v50 }
  0x5f   :  { %786 = vmatmul.f32.vlgmr.msra.gmra.mxu0 %v2979_v37  ;;  %1153 = vmatpush.msra.mxu2 %v3081_v57 }
  0x60   :  { %815 = vmatmul.f32.vlgmr.msra.gmra.mxu1 %v2979_v37  ;;  %1064 = vmatpush.msra.mxu0 %v3042_v33  ;;  %v1330_v37 = vand.u32 4294901760, %v3127_v36 }
  0x61   :  { %1105 = vmatpush.msra.mxu1 %v1104_v15  ;;  %1185 = vmatpush.msra.mxu3 %v3073_v53  ;;  %v1343_v15 = vsub.f32 %v3151_v20, %v1342_v61 }
  0x62   :  { %862 = vmatmul.f32.gmra.mxu2 %v861_v31  ;;  %1066 = vmatpush.msra.mxu0 %v3057_v50  ;;  %v1331_v48 = vsub.f32 %v3127_v36, %v1330_v37 }
  0x63   :  { %907 = vmatmul.f32.gmra.mxu3 %v3046_v27  ;;  %1111 = vmatpush.msra.mxu1 %v1110_v11  ;;  %v1344_v31 = vand.u32 4294901760, %v1343_v15 }
  0x64   :  { %1068 = vmatpush.msra.mxu0 %v3073_v53  ;;  %1156 = vmatpush.msra.mxu2 %v3089_v60  ;;  %v1332_v1 = vand.u32 4294901760, %v1331_v48 }
  0x65   :  { %1117 = vmatpush.msra.mxu1 %v1116_v24  ;;  %1187 = vmatpush.msra.mxu3 %v3083_v58 }
  0x66   :  { %1070 = vmatpush.msra.mxu0 %v3083_v58 }
  0x67   :  { %790 = vmatmul.f32.gmra.mxu0 %v3010_v29  ;;  %1123 = vmatpush.msra.mxu1 %v1122_v34  ;;  %v3267_v34 = vand.u32 4294901760, %v90_v23 }
  0x68   :  { %819 = vmatmul.f32.gmra.mxu1 %v3010_v29  ;;  %v121_v29 = vperm.slane %v112_v46, 0 }
  0x69   :  { %v3273_v42 = vsub.f32 %v90_v23, %v3267_v34 }
  0x6a   :  { %1008 = vmatmul.f32.vlgmr.msrb.gmra.mxu2 %v3022_v14  ;;  %v3182_v22 = vsub.f32 %v2733_v7, %v121_v29 }
  0x6b   :  { %1037 = vmatmul.f32.vlgmr.msrb.gmra.mxu3 %v3022_v14  ;;  %1286 = vmatpush.msrb.mxu2 %v3106_v12  ;;  %v1072_v14 = vsub.f32 %v1046_v52, %v3168_v49  ;;  %v1564_v46 = vand.u32 4294901760, %v3273_v42  ;;  %v113_v52 = vrot.slane %v2735_v8, 6 }
  0x6c   :  { %1327 = vmatpush.msrb.mxu3 %v1326_v55  ;;  %v97_v55 = vld [vmem:[#allocation7 + $0xf8] sm:$0xff] }
  0x6d   :  { %1288 = vmatpush.msrb.mxu2 %v3116_v38  ;;  %v1073_v11 = vand.u32 4294901760, %v1072_v14  ;;  %v3290_v56 = vand.u32 4294901760, %v97_v55 }
  0x6e   :  { %1333 = vmatpush.msrb.mxu3 %v1332_v1 }
  0x6f   :  { %937 = vmatmul.f32.vlgmr.msrb.gmra.mxu0 %v3033_v35  ;;  %1290 = vmatpush.msrb.mxu2 %v3129_v16  ;;  %v3195_v35 = vand.u32 4294901760, %v1049_v26  ;;  %v3298_v15 = vsub.f32 %v97_v55, %v3290_v56 }
  0x70   :  { %969 = vmatmul.f32.vlgmr.msrb.gmra.mxu1 %v851_v39  ;;  %1216 = vmatpush.msrb.mxu0 %v1102_v54  ;;  %v1268_v39 = vsel %vm156_vm0, %v3182_v22, 0 }
  0x71   :  { %1251 = vmatpush.msrb.mxu1 %v3042_v33  ;;  %1339 = vmatpush.msrb.mxu3 %v1338_v10  ;;  %v3206_v33 = vand.u32 4294901760, %v1268_v39  ;;  %v1080_v45 = vsub.f32 %v1049_v26, %v3195_v35 }
  0x72   :  { %1012 = vmatmul.f32.gmra.mxu2 %v3046_v27  ;;  %1220 = vmatpush.msrb.mxu0 %v1108_v32 }
  0x73   :  { %1041 = vmatmul.f32.gmra.mxu3 %v3046_v27  ;;  %1253 = vmatpush.msrb.mxu1 %v3057_v50  ;;  %v1074_v27 = vsub.f32 %v1072_v14, %v1073_v11  ;;  %v3212_v50 = vsub.f32 %v2740_v13, %v121_v29  ;;  %v3217_v44 = vsub.f32 %v1268_v39, %v3206_v33  ;;  %v1081_v54 = vand.u32 4294901760, %v1080_v45  ;;  %v96_v29 = vld [vmem:[#allocation7 + $0xf0] sm:$0xff]  ;;  %v95_v39 = vld [vmem:[#allocation7 + $0xe8] sm:$0xff] }
  0x74   :  { %1224 = vmatpush.msrb.mxu0 %v1114_v63  ;;  %1292 = vmatpush.msrb.mxu2 %v3137_v18 }
  0x75   :  { %1255 = vmatpush.msrb.mxu1 %v3073_v53  ;;  %1345 = vmatpush.msrb.mxu3 %v1344_v31  ;;  %v1075_v53 = vand.u32 4294901760, %v1074_v27  ;;  %v1271_v57 = vsel %vm156_vm0, %v3212_v50, 0  ;;  %v1082_v60 = vsub.f32 %v1080_v45, %v1081_v54  ;;  %v1565_v31 = vsub.f32 %v3273_v42, %v1564_v46 }
  0x76   :  { %1228 = vmatpush.msrb.mxu0 %v1120_v2  ;;  %v3230_v32 = vand.u32 4294901760, %v1271_v57  ;;  %v92_v2 = vld [vmem:[#allocation7 + $0xd0] sm:$0xff]  ;;  %v1768_v27 = vand.u32 4294901760, %v3298_v15 }
  0x77   :  { %942 = vmatmul.f32.gmra.mxu0 %v3064_v51  ;;  %1257 = vmatpush.msrb.mxu1 %v3083_v58  ;;  %v93_v58 = vld [vmem:[#allocation7 + $0xd8] sm:$0xff]  ;;  %v3248_v17 = vand.u32 4294901760, %v92_v2 }
  0x78   :  { %975 = vmatmul.f32.gmra.mxu1 %v859_v47  ;;  %v3226_v51 = vand.u32 4294901760, %v93_v58  ;;  %v1295_v47 = vand.u32 4294901760, %v3217_v44  ;;  %v3246_v9 = vsub.f32 %v1271_v57, %v3230_v32  ;;  %v94_v57 = vld [vmem:[#allocation7 + $0xe0] sm:$0xff] }
  0x7a   :  { %1159 = vmatmul.f32.vlgmr.msra.gmra.mxu2 %v1072_v14  ;;  %v3239_v63 = vsub.f32 %v93_v58, %v3226_v51  ;;  %v1296_v5 = vsub.f32 %v3217_v44, %v1295_v47  ;;  %v3300_v14 = vand.u32 4294901760, %v96_v29 }
  0x7b   :  { %1191 = vmatmul.f32.vlgmr.msra.gmra.mxu3 %v1073_v11  ;;  %1438 = vmatpush.msra.mxu2 %v1324_v43  ;;  %v3255_v43 = vsub.f32 %v92_v2, %v3248_v17  ;;  %v122_v11 = vperm.slane %v113_v52, 0  ;;  %v1566_v2 = vand.u32 4294901760, %v1565_v31 }
  0x7c   :  { %1473 = vmatpush.msra.mxu3 %v3106_v12 }
  0x7d   :  { %1442 = vmatpush.msra.mxu2 %v1330_v37  ;;  %v1297_v37 = vand.u32 4294901760, %v1296_v5  ;;  %v3325_v5 = vsub.f32 %v2733_v7, %v122_v11 }
  0x7e   :  { %1475 = vmatpush.msra.mxu3 %v3116_v38 }
  0x7f   :  { %1076 = vmatmul.f32.vlgmr.msra.gmra.mxu0 %v1075_v53  ;;  %1446 = vmatpush.msra.mxu2 %v1336_v28  ;;  %v3313_v53 = vand.u32 4294901760, %v95_v39 }
  0x80   :  { %1125 = vmatmul.f32.vlgmr.msra.gmra.mxu1 %v3168_v49  ;;  %1369 = vmatpush.msra.mxu0 %v3114_v3  ;;  %v91_v3 = vld [vmem:[#allocation7 + $0xc8] sm:$0xff] }
  0x81   :  { %1403 = vmatpush.msra.mxu1 %v3106_v12  ;;  %1477 = vmatpush.msra.mxu3 %v3129_v16  ;;  %v1083_v12 = vand.u32 4294901760, %v1082_v60  ;;  %v3257_v24 = vand.u32 4294901760, %v91_v3  ;;  %v3321_v60 = vand.u32 4294901760, %v94_v57 }
  0x82   :  { %1164 = vmatmul.f32.gmra.mxu2 %v1080_v45  ;;  %1372 = vmatpush.msra.mxu0 %v3127_v36  ;;  %v1546_v36 = vand.u32 4294901760, %v3239_v63  ;;  %v3311_v45 = vsub.f32 %v96_v29, %v3300_v14 }
  0x83   :  { %1197 = vmatmul.f32.gmra.mxu3 %v1081_v54  ;;  %1405 = vmatpush.msra.mxu1 %v3116_v38  ;;  %v1303_v38 = vand.u32 4294901760, %v3246_v9  ;;  %v3335_v23 = vsub.f32 %v94_v57, %v3321_v60 }
  0x84   :  { %1375 = vmatpush.msra.mxu0 %v3135_v30  ;;  %1450 = vmatpush.msra.mxu2 %v1342_v61  ;;  %v3265_v30 = vsub.f32 %v91_v3, %v3257_v24  ;;  %v1547_v28 = vsub.f32 %v3239_v63, %v1546_v36  ;;  %v1774_v58 = vand.u32 4294901760, %v3311_v45 }
  0x85   :  { %1407 = vmatpush.msra.mxu1 %v3129_v16  ;;  %1479 = vmatpush.msra.mxu3 %v3137_v18  ;;  %v1552_v16 = vand.u32 4294901760, %v3255_v43  ;;  %v1304_v48 = vsub.f32 %v3246_v9, %v1303_v38  ;;  %v1786_v52 = vand.u32 4294901760, %v3335_v23 }
  0x86   :  { %1378 = vmatpush.msra.mxu0 %v3151_v20  ;;  %v1558_v20 = vand.u32 4294901760, %v3265_v30  ;;  %v1548_v61 = vand.u32 4294901760, %v1547_v28  ;;  %v1775_v7 = vsub.f32 %v3311_v45, %v1774_v58  ;;  %v114_v28 = vrot.slane %v2735_v8, 7 }
  0x87   :  { %1084 = vmatmul.f32.gmra.mxu0 %v1083_v12  ;;  %1409 = vmatpush.msra.mxu1 %v3137_v18  ;;  %v1553_v18 = vsub.f32 %v3255_v43, %v1552_v16  ;;  %v1305_v10 = vand.u32 4294901760, %v1304_v48  ;;  %v1769_v12 = vsub.f32 %v3298_v15, %v1768_v27  ;;  %v1787_v31 = vsub.f32 %v3335_v23, %v1786_v52 }
  0x88   :  { %1129 = vmatmul.f32.gmra.mxu1 %v3195_v35  ;;  %v1559_v1 = vsub.f32 %v3265_v30, %v1558_v20 }
  0x89   :  { %v1554_v26 = vand.u32 4294901760, %v1553_v18  ;;  %v1770_v48 = vand.u32 4294901760, %v1769_v12  ;;  %v1788_v57 = vand.u32 4294901760, %v1787_v31 }
  0x8a   :  { %1298 = vmatmul.f32.vlgmr.msrb.gmra.mxu2 %v1297_v37  ;;  %v1560_v54 = vand.u32 4294901760, %v1559_v1  ;;  %v1490_v37 = vsel %vm156_vm0, %v3325_v5, 0  ;;  %v123_v1 = vperm.slane %v114_v28, 0 }
  0x8b   :  { %1347 = vmatmul.f32.vlgmr.msrb.gmra.mxu3 %v3206_v33  ;;  %1591 = vmatpush.msrb.mxu2 %v3239_v63  ;;  %v3351_v55 = vand.u32 4294901760, %v1490_v37 }
  0x8c   :  { %1625 = vmatpush.msrb.mxu3 %v3226_v51 }
  0x8d   :  { %1594 = vmatpush.msrb.mxu2 %v3255_v43 }
  0x8e   :  { %1627 = vmatpush.msrb.mxu3 %v3248_v17 }
  0x8f   :  { %1230 = vmatmul.f32.vlgmr.msrb.gmra.mxu0 %v3168_v49  ;;  %1597 = vmatpush.msrb.mxu2 %v3265_v30 }
  0x90   :  { %1259 = vmatmul.f32.vlgmr.msrb.gmra.mxu1 %v3168_v49  ;;  %1508 = vmatpush.msrb.mxu0 %v3226_v51  ;;  %v3319_v49 = vsub.f32 %v95_v39, %v3313_v53 }
  0x91   :  { %1549 = vmatpush.msrb.mxu1 %v1548_v61  ;;  %1629 = vmatpush.msrb.mxu3 %v3257_v24  ;;  %v1776_v61 = vand.u32 4294901760, %v1775_v7 }
  0x92   :  { %1306 = vmatmul.f32.gmra.mxu2 %v1305_v10  ;;  %1510 = vmatpush.msrb.mxu0 %v3248_v17  ;;  %v1780_v3 = vand.u32 4294901760, %v3319_v49 }
  0x93   :  { %1351 = vmatmul.f32.gmra.mxu3 %v3230_v32  ;;  %1555 = vmatpush.msrb.mxu1 %v1554_v26 }
  0x94   :  { %1512 = vmatpush.msrb.mxu0 %v3257_v24  ;;  %1600 = vmatpush.msrb.mxu2 %v3273_v42  ;;  %v1781_v18 = vsub.f32 %v3319_v49, %v1780_v3 }
  0x95   :  { %1561 = vmatpush.msrb.mxu1 %v1560_v54  ;;  %1631 = vmatpush.msrb.mxu3 %v3267_v34  ;;  %v3365_v54 = vld [vmem:[#allocation2] sm:$0xff] }
  0x96   :  { %1514 = vmatpush.msrb.mxu0 %v3267_v34  ;;  %v1782_v26 = vand.u32 4294901760, %v1781_v18 }
  0x97   :  { %1234 = vmatmul.f32.gmra.mxu0 %v3195_v35  ;;  %1567 = vmatpush.msrb.mxu1 %v1566_v2 }
  0x98   :  { %1263 = vmatmul.f32.gmra.mxu1 %v3195_v35  ;;  %v3356_v35 = vsub.f32 %v2740_v13, %v122_v11  ;;  %v3368_v13 = vsub.f32 %v3365_v54, %v123_v1 }
  0x9a   :  { %1452 = vmatmul.f32.vlgmr.msra.gmra.mxu2 %v3206_v33  ;;  %v1493_v11 = vsel %vm156_vm0, %v3356_v35, 0 }
  0x9b   :  { %1481 = vmatmul.f32.vlgmr.msra.gmra.mxu3 %v3206_v33  ;;  %1730 = vmatpush.msra.mxu2 %v3290_v56  ;;  %v1516_v33 = vsub.f32 %v1490_v37, %v3351_v55 }
  0x9c   :  { %v189_v8 = vpop.f32.mrf.mxu0  ;;  %1771 = vmatpush.msra.mxu3 %v1770_v48 }
  0x9d   :  { %v238_v29 = vpop.f32.mrf.mxu1  ;;  %v272_v10 = vpop.f32.mrf.mxu2  ;;  %1732 = vmatpush.msra.mxu2 %v3300_v14  ;;  %v1517_v2 = vand.u32 4294901760, %v1516_v33 }
  0x9e   :  { %v304_v39 = vpop.f32.mrf.mxu3  ;;  %1777 = vmatpush.msra.mxu3 %v1776_v61  ;;  %v239_v12 = vadd.f32 %v238_v29, %v189_v8 }
  0x9f   :  { %1381 = vmatmul.f32.vlgmr.msra.gmra.mxu0 %v3217_v44  ;;  %1734 = vmatpush.msra.mxu2 %v3313_v53  ;;  %v3381_v44 = vand.u32 4294901760, %v1493_v11 }
  0xa0   :  { %1413 = vmatmul.f32.vlgmr.msra.gmra.mxu1 %v1295_v47  ;;  %1660 = vmatpush.msra.mxu0 %v1546_v36  ;;  %v1712_v47 = vsel %vm156_vm0, %v3368_v13, 0 }
  0xa1   :  { %1695 = vmatpush.msra.mxu1 %v3226_v51  ;;  %1783 = vmatpush.msra.mxu3 %v1782_v26  ;;  %v1524_v30 = vsub.f32 %v1493_v11, %v3381_v44 }
  0xa2   :  { %1456 = vmatmul.f32.gmra.mxu2 %v3230_v32  ;;  %1664 = vmatpush.msra.mxu0 %v1552_v16  ;;  %v273_v16 = vadd.f32 %v272_v10, %v239_v12 }
  0xa3   :  { %1485 = vmatmul.f32.gmra.mxu3 %v3230_v32  ;;  %1697 = vmatpush.msra.mxu1 %v3248_v17  ;;  %v1518_v32 = vsub.f32 %v1516_v33, %v1517_v2  ;;  %v3392_v17 = vand.u32 4294901760, %v1712_v47  ;;  %v1525_v28 = vand.u32 4294901760, %v1524_v30 }
  0xa4   :  { %v197_v63 = vpop.f32.mrf.mxu0  ;;  %1668 = vmatpush.msra.mxu0 %v1558_v20  ;;  %1736 = vmatpush.msra.mxu2 %v3321_v60  ;;  %v3397_v20 = vld [vmem:[#allocation2 + $0x8] sm:$0x3] }
  0xa5   :  { %v242_v51 = vpop.f32.mrf.mxu1  ;;  %v277_v36 = vpop.f32.mrf.mxu2  ;;  %1699 = vmatpush.msra.mxu1 %v3257_v24  ;;  %1789 = vmatpush.msra.mxu3 %v1788_v57  ;;  %v3400_v7 = vsub.f32 %v3397_v20, %v123_v1  ;;  %v1519_v24 = vand.u32 4294901760, %v1518_v32  ;;  %v3405_v42 = vsub.f32 %v1712_v47, %v3392_v17  ;;  %v1526_v31 = vsub.f32 %v1524_v30, %v1525_v28 }
  0xa6   :  { %v310_v43 = vpop.f32.mrf.mxu3  ;;  %1672 = vmatpush.msra.mxu0 %v1564_v46  ;;  %v305_v46 = vadd.f32 %v304_v39, %v273_v16  ;;  %v243_v37 = vadd.f32 %v242_v51, %v197_v63 }
  0xa7   :  { %1386 = vmatmul.f32.gmra.mxu0 %v3246_v9  ;;  %1701 = vmatpush.msra.mxu1 %v3267_v34  ;;  %v1715_v34 = vsel %vm156_vm0, %v3400_v7, 0  ;;  %v101_v9 = vld [vmem:[#allocation7 + $0x118] sm:$0xff]  ;;  %v1739_v29 = vand.u32 4294901760, %v3405_v42  ;;  %v1527_v57 = vand.u32 4294901760, %v1526_v31 }
  0xa8   :  { %1419 = vmatmul.f32.gmra.mxu1 %v1303_v38  ;;  %v3414_v1 = vand.u32 4294901760, %v101_v9  ;;  %v278_v10 = vadd.f32 %v277_v36, %v243_v37 }
  0xa9   :  { %v1740_v11 = vsub.f32 %v3405_v42, %v1739_v29 }
  0xaa   :  { %1603 = vmatmul.f32.vlgmr.msrb.gmra.mxu2 %v1516_v33  ;;  %v3428_v39 = vsub.f32 %v101_v9, %v3414_v1  ;;  %v100_v33 = vld [vmem:[#allocation7 + $0x110] sm:$0xff] }
  0xab   :  { %1635 = vmatmul.f32.vlgmr.msrb.gmra.mxu3 %v1517_v2  ;;  %1882 = vmatpush.msrb.mxu2 %v1768_v27  ;;  %v3418_v27 = vand.u32 4294901760, %v1715_v34  ;;  %v99_v2 = vld [vmem:[#allocation7 + $0x108] sm:$0xff] }
  0xac   :  { %v343_v48 = vpop.f32.mrf.mxu0  ;;  %1917 = vmatpush.msrb.mxu3 %v3290_v56 }
  0xad   :  { %v344_v38 = vadd.f32 %v343_v48, %v305_v46  ;;  %v372_v18 = vpop.f32.mrf.mxu1  ;;  %v411_v61 = vpop.f32.mrf.mxu2  ;;  %1886 = vmatpush.msrb.mxu2 %v1774_v58 }
  0xae   :  { %v460_v8 = vpop.f32.mrf.mxu3  ;;  %1919 = vmatpush.msrb.mxu3 %v3300_v14 }
  0xaf   :  { %v373_v26 = vadd.f32 %v372_v18, %v344_v38  ;;  %1520 = vmatmul.f32.vlgmr.msrb.gmra.mxu0 %v1519_v24  ;;  %1890 = vmatpush.msrb.mxu2 %v1780_v3  ;;  %v3435_v3 = vsub.f32 %v1715_v34, %v3418_v27  ;;  %v461_v34 = vadd.f32 %v460_v8, %v411_v61  ;;  %v105_v38 = vld [vmem:[#allocation7 + $0x138] sm:$0xff] }
  0xb0   :  { %1569 = vmatmul.f32.vlgmr.msrb.gmra.mxu1 %v3351_v55  ;;  %1813 = vmatpush.msrb.mxu0 %v3298_v15  ;;  %v3437_v15 = vand.u32 4294901760, %v100_v33  ;;  %v3487_v61 = vand.u32 4294901760, %v105_v38 }
  0xb1   :  { %v2377_v58 = vmul.f32 %v373_v26, %v2757_v19  ;;  %1847 = vmatpush.msrb.mxu1 %v3290_v56  ;;  %1921 = vmatpush.msrb.mxu3 %v3313_v53  ;;  %v311_v19 = vadd.f32 %v310_v43, %v278_v10  ;;  %v98_v43 = vld [vmem:[#allocation7 + $0x100] sm:$0xff]  ;;  %v1747_v16 = vand.u32 4294901760, %v3435_v3  ;;  %v3485_v10 = vld [vmem:[#allocation5 + $0x8] sm:$0x3] }
  0xb2   :  { %1608 = vmatmul.f32.gmra.mxu2 %v1524_v30  ;;  %1816 = vmatpush.msrb.mxu0 %v3311_v45  ;;  %v3443_v47 = vsub.f32 %v100_v33, %v3437_v15  ;;  %v3445_v45 = vand.u32 4294901760, %v99_v2  ;;  %v3461_v24 = vand.u32 4294901760, %v98_v43 }
  0xb3   :  { %v2397_v56 = vsel %vm156_vm0, %v2377_v58, 0.0  ;;  %1641 = vmatmul.f32.gmra.mxu3 %v1525_v28  ;;  %1849 = vmatpush.msrb.mxu1 %v3300_v14  ;;  %v1990_v14 = vand.u32 4294901760, %v3428_v39 }
  0xb4   :  { %v347_v12 = vpop.f32.mrf.mxu0  ;;  %2398 = vadd.xlane.f32.xlu0 %v2397_v56  ;;  %1819 = vmatpush.msrb.mxu0 %v3319_v49  ;;  %v1741_v49 = vand.u32 4294901760, %v1740_v11  ;;  %v3459_v30 = vsub.f32 %v99_v2, %v3445_v45  ;;  %v3467_v46 = vsub.f32 %v98_v43, %v3461_v24  ;;  %v104_v11 = vld [vmem:[#allocation7 + $0x130] sm:$0xff]  ;;  %v124_v43 = vperm.slane %v3485_v10, 0 }
  0xb5   :  { %v348_v63 = vadd.f32 %v347_v12, %v311_v19  ;;  %v376_v51 = vpop.f32.mrf.mxu1  ;;  %v3447_v36 = vpop.f32.mrf.mxu2  ;;  %1851 = vmatpush.msrb.mxu1 %v3313_v53  ;;  %1894 = vmatpush.msrb.mxu2 %v1786_v52  ;;  %v1996_v52 = vand.u32 4294901760, %v3443_v47  ;;  %v1991_v37 = vsub.f32 %v3428_v39, %v1990_v14  ;;  %v3497_v2 = vand.u32 4294901760, %v104_v11 }
  0xb6   :  { %v3453_v32 = vpop.f32.mrf.mxu3  ;;  %1822 = vmatpush.msrb.mxu0 %v3335_v23  ;;  %1923 = vmatpush.msrb.mxu3 %v3321_v60  ;;  %v2002_v28 = vand.u32 4294901760, %v3459_v30  ;;  %v2008_v9 = vand.u32 4294901760, %v3467_v46 }
  0xb7   :  { %v377_v53 = vadd.f32 %v376_v51, %v348_v63  ;;  %1528 = vmatmul.f32.gmra.mxu0 %v1527_v57  ;;  %1853 = vmatpush.msrb.mxu1 %v3321_v60  ;;  %v1748_v60 = vsub.f32 %v3435_v3, %v1747_v16  ;;  %v1992_v58 = vand.u32 4294901760, %v1991_v37  ;;  %v3495_v57 = vsub.f32 %v105_v38, %v3487_v61 }
  0xb8   :  { %1573 = vmatmul.f32.gmra.mxu1 %v3381_v44  ;;  %v2003_v33 = vsub.f32 %v3459_v30, %v2002_v28  ;;  %v2009_v51 = vsub.f32 %v3467_v46, %v2008_v9 }
  0xb9   :  { %v2378_v23 = vmul.f32 %v377_v53, %v2762_v21  ;;  %v1997_v21 = vsub.f32 %v3443_v47, %v1996_v52  ;;  %v1749_v56 = vand.u32 4294901760, %v1748_v60  ;;  %v2212_v53 = vand.u32 4294901760, %v3495_v57 }
  0xba   :  { %1742 = vmatmul.f32.vlgmr.msra.gmra.mxu2 %v1741_v49  ;;  %v103_v49 = vld [vmem:[#allocation7 + $0x128] sm:$0xff] }
  0xbb   :  { %v2401_v48 = vsel %vm2400_vm1, %v2378_v23, 0.0  ;;  %1791 = vmatmul.f32.vlgmr.msra.gmra.mxu3 %v3392_v17  ;;  %2035 = vmatpush.msra.mxu2 %v3428_v39  ;;  %v1998_v63 = vand.u32 4294901760, %v1997_v21  ;;  %v3509_v23 = vsub.f32 %v104_v11, %v3497_v2  ;;  %v3511_v37 = vand.u32 4294901760, %v103_v49 }
  0xbc   :  { %v494_v18 = vpop.f32.mrf.mxu0  ;;  %2402 = vadd.xlane.f32.xlu0 %v2401_v48  ;;  %2069 = vmatpush.msra.mxu3 %v3414_v1  ;;  %v102_v48 = vld [vmem:[#allocation7 + $0x120] sm:$0xff] }
  0xbd   :  { %v495_v8 = vadd.f32 %v494_v18, %v461_v34  ;;  %v526_v26 = vpop.f32.mrf.mxu1  ;;  %v565_v31 = vpop.f32.mrf.mxu2  ;;  %2038 = vmatpush.msra.mxu2 %v3443_v47  ;;  %v2004_v34 = vand.u32 4294901760, %v2003_v33  ;;  %v3517_v21 = vsub.f32 %v103_v49, %v3511_v37  ;;  %v3519_v38 = vand.u32 4294901760, %v102_v48 }
  0xbe   :  { %v594_v19 = vpop.f32.mrf.mxu3  ;;  %2071 = vmatpush.msra.mxu3 %v3437_v15  ;;  %v465_v18 = vadd.f32 %v3453_v32, %v3447_v36  ;;  %v2213_v33 = vsub.f32 %v3495_v57, %v2212_v53 }
  0xbf   :  { %v527_v12 = vadd.f32 %v526_v26, %v495_v8  ;;  %1674 = vmatmul.f32.vlgmr.msra.gmra.mxu0 %v3351_v55  ;;  %2041 = vmatpush.msra.mxu2 %v3459_v30  ;;  %v2010_v26 = vand.u32 4294901760, %v2009_v51  ;;  %v2224_v51 = vand.u32 4294901760, %v3517_v21 }
  0xc0   :  { %1703 = vmatmul.f32.vlgmr.msra.gmra.mxu1 %v3351_v55  ;;  %1952 = vmatpush.msra.mxu0 %v3414_v1  ;;  %v2218_v55 = vand.u32 4294901760, %v3509_v23 }
  0xc1   :  { %v566_v60 = vadd.f32 %v565_v31, %v527_v12  ;;  %1993 = vmatpush.msra.mxu1 %v1992_v58  ;;  %2073 = vmatpush.msra.mxu3 %v3445_v45  ;;  %v3525_v31 = vsub.f32 %v3365_v54, %v124_v43 }
  0xc2   :  { %1750 = vmatmul.f32.gmra.mxu2 %v1749_v56  ;;  %1954 = vmatpush.msra.mxu0 %v3437_v15 }
  0xc3   :  { %v595_v8 = vadd.f32 %v594_v19, %v566_v60  ;;  %1795 = vmatmul.f32.gmra.mxu3 %v3418_v27  ;;  %1999 = vmatpush.msra.mxu1 %v1998_v63  ;;  %v3535_v19 = vsub.f32 %v102_v48, %v3519_v38  ;;  %v2219_v63 = vsub.f32 %v3509_v23, %v2218_v55  ;;  %v115_v60 = vrot.slane %v3485_v10, 1 }
  0xc4   :  { %v499_v58 = vpop.f32.mrf.mxu0  ;;  %1956 = vmatpush.msra.mxu0 %v3445_v45  ;;  %2044 = vmatpush.msra.mxu2 %v3467_v46  ;;  %v2214_v48 = vand.u32 4294901760, %v2213_v33  ;;  %v3558_v33 = vsub.f32 %v3397_v20, %v124_v43 }
  0xc5   :  { %v500_v11 = vadd.f32 %v499_v58, %v465_v18  ;;  %v532_v56 = vpop.f32.mrf.mxu1  ;;  %v569_v36 = vpop.f32.mrf.mxu2  ;;  %v2379_v32 = vmul.f32 %v595_v8, %v2822_v62  ;;  %2005 = vmatpush.msra.mxu1 %v2004_v34  ;;  %2075 = vmatpush.msra.mxu3 %v3461_v24  ;;  %v1934_v34 = vsel %vm156_vm0, %v3525_v31, 0  ;;  %v2230_v8 = vand.u32 4294901760, %v3535_v19 }
  0xc6   :  { %v598_v12 = vpop.f32.mrf.mxu3  ;;  %1958 = vmatpush.msra.mxu0 %v3461_v24  ;;  %v3550_v58 = vand.u32 4294901760, %v1934_v34 }
  0xc7   :  { %v533_v49 = vadd.f32 %v532_v56, %v500_v11  ;;  %1678 = vmatmul.f32.gmra.mxu0 %v3381_v44  ;;  %v2404_v62 = vsel %vm156_vm0, %v2379_v32, 0.0  ;;  %2011 = vmatpush.msra.mxu1 %v2010_v26  ;;  %v2220_v11 = vand.u32 4294901760, %v2219_v63  ;;  %v2225_v26 = vsub.f32 %v3517_v21, %v2224_v51 }
  0xc8   :  { %2405 = vadd.xlane.f32.xlu1 %v2404_v62  ;;  %1707 = vmatmul.f32.gmra.mxu1 %v3381_v44  ;;  %v125_v56 = vperm.slane %v115_v60, 0 }
  0xc9   :  { %v570_v18 = vadd.f32 %v569_v36, %v533_v49  ;;  %v2226_v62 = vand.u32 4294901760, %v2225_v26 }
  0xca   :  { %1896 = vmatmul.f32.vlgmr.msrb.gmra.mxu2 %v3392_v17  ;;  %v3570_v60 = vsub.f32 %v3365_v54, %v125_v56 }
  0xcb   :  { %v599_v10 = vadd.f32 %v598_v12, %v570_v18  ;;  %1925 = vmatmul.f32.vlgmr.msrb.gmra.mxu3 %v3392_v17  ;;  %2174 = vmatpush.msrb.mxu2 %v3487_v61  ;;  %v2231_v12 = vsub.f32 %v3535_v19, %v2230_v8  ;;  %v1960_v17 = vsub.f32 %v1934_v34, %v3550_v58 }
  0xcc   :  { %v633_v44 = vpop.f32.mrf.mxu0  ;;  %2215 = vmatpush.msrb.mxu3 %v2214_v48 }
  0xcd   :  { %v682_v36 = vpop.f32.mrf.mxu1  ;;  %v716_v32 = vpop.f32.mrf.mxu2  ;;  %v2380_v49 = vmul.f32 %v599_v10, %v2826_v0  ;;  %2176 = vmatpush.msrb.mxu2 %v3497_v2  ;;  %v1937_v0 = vsel %vm156_vm0, %v3558_v33, 0  ;;  %v2232_v34 = vand.u32 4294901760, %v2231_v12  ;;  %v1961_v48 = vand.u32 4294901760, %v1960_v17 }
  0xce   :  { %v748_v63 = vpop.f32.mrf.mxu3  ;;  %2221 = vmatpush.msrb.mxu3 %v2220_v11  ;;  %v683_v18 = vadd.f32 %v682_v36, %v633_v44  ;;  %v3583_v54 = vand.u32 4294901760, %v1937_v0 }
  0xcf   :  { %1825 = vmatmul.f32.vlgmr.msrb.gmra.mxu0 %v3405_v42  ;;  %v2407_v43 = vsel %vm2400_vm1, %v2380_v49, 0.0  ;;  %2178 = vmatpush.msrb.mxu2 %v3511_v37  ;;  %v2156_v42 = vsel %vm156_vm0, %v3570_v60, 0 }
  0xd0   :  { %2408 = vadd.xlane.f32.xlu1 %v2407_v43  ;;  %1857 = vmatmul.f32.vlgmr.msrb.gmra.mxu1 %v1739_v29  ;;  %v3592_v47 = vand.u32 4294901760, %v2156_v42  ;;  %v1968_v11 = vsub.f32 %v1937_v0, %v3583_v54 }
  0xd1   :  { %2104 = vmatpush.msrb.mxu0 %v1990_v14  ;;  %2139 = vmatpush.msrb.mxu1 %v3414_v1  ;;  %v1962_v14 = vsub.f32 %v1960_v17, %v1961_v48 }
  0xd2   :  { %1900 = vmatmul.f32.gmra.mxu2 %v3418_v27  ;;  %2227 = vmatpush.msrb.mxu3 %v2226_v62  ;;  %v3605_v30 = vsub.f32 %v2156_v42, %v3592_v47  ;;  %v1969_v10 = vand.u32 4294901760, %v1968_v11 }
  0xd3   :  { %1929 = vmatmul.f32.gmra.mxu3 %v3418_v27  ;;  %2108 = vmatpush.msrb.mxu0 %v1996_v52  ;;  %v717_v52 = vadd.f32 %v716_v32, %v683_v18 }
  0xd4   :  { %v641_v29 = vpop.f32.mrf.mxu0  ;;  %2141 = vmatpush.msrb.mxu1 %v3437_v15  ;;  %2180 = vmatpush.msrb.mxu2 %v3519_v38  ;;  %v3597_v15 = vsub.f32 %v3397_v20, %v125_v56  ;;  %v2183_v56 = vand.u32 4294901760, %v3605_v30  ;;  %v1970_v32 = vsub.f32 %v1968_v11, %v1969_v10 }
  0xd5   :  { %v686_v1 = vpop.f32.mrf.mxu1  ;;  %v721_v39 = vpop.f32.mrf.mxu2  ;;  %2112 = vmatpush.msrb.mxu0 %v2002_v28  ;;  %2233 = vmatpush.msrb.mxu3 %v2232_v34  ;;  %v749_v28 = vadd.f32 %v748_v63, %v717_v52 }
  0xd6   :  { %v754_v27 = vpop.f32.mrf.mxu3  ;;  %2143 = vmatpush.msrb.mxu1 %v3445_v45  ;;  %v1963_v45 = vand.u32 4294901760, %v1962_v14  ;;  %v687_v26 = vadd.f32 %v686_v1, %v641_v29  ;;  %v2159_v20 = vsel %vm156_vm0, %v3597_v15, 0  ;;  %v2184_v49 = vsub.f32 %v3605_v30, %v2183_v56 }
  0xd7   :  { %1830 = vmatmul.f32.gmra.mxu0 %v3435_v3  ;;  %v3616_v44 = vand.u32 4294901760, %v2159_v20 }
  0xd8   :  { %1863 = vmatmul.f32.gmra.mxu1 %v1747_v16  ;;  %2116 = vmatpush.msrb.mxu0 %v2008_v9  ;;  %v2185_v43 = vand.u32 4294901760, %v2184_v49 }
  0xd9   :  { %2145 = vmatpush.msrb.mxu1 %v3461_v24  ;;  %v3630_v12 = vsub.f32 %v2159_v20, %v3616_v44 }
  0xda   :  { %2047 = vmatmul.f32.vlgmr.msra.gmra.mxu2 %v1960_v17 }
  0xdb   :  { %2079 = vmatmul.f32.vlgmr.msra.gmra.mxu3 %v1961_v48  ;;  %2326 = vmatpush.msra.mxu2 %v2212_v53  ;;  %v722_v53 = vadd.f32 %v721_v39, %v687_v26  ;;  %v2191_v0 = vand.u32 4294901760, %v3630_v12 }
  0xdc   :  { %v787_v3 = vpop.f32.mrf.mxu0  ;;  %2361 = vmatpush.msra.mxu3 %v3487_v61 }
  0xdd   :  { %v788_v16 = vadd.f32 %v787_v3, %v749_v28  ;;  %v816_v24 = vpop.f32.mrf.mxu1  ;;  %v855_v46 = vpop.f32.mrf.mxu2  ;;  %2330 = vmatpush.msra.mxu2 %v2218_v55 }
  0xde   :  { %v904_v9 = vpop.f32.mrf.mxu3  ;;  %2363 = vmatpush.msra.mxu3 %v3497_v2 }
  0xdf   :  { %v817_v36 = vadd.f32 %v816_v24, %v788_v16  ;;  %1964 = vmatmul.f32.vlgmr.msra.gmra.mxu0 %v1963_v45  ;;  %2334 = vmatpush.msra.mxu2 %v2224_v51  ;;  %v755_v51 = vadd.f32 %v754_v27, %v722_v53 }
  0xe0   :  { %2013 = vmatmul.f32.vlgmr.msra.gmra.mxu1 %v3550_v58  ;;  %2257 = vmatpush.msra.mxu0 %v3495_v57  ;;  %v1971_v57 = vand.u32 4294901760, %v1970_v32 }
  0xe1   :  { %v2381_v55 = vmul.f32 %v817_v36, %v2948_v59  ;;  %2291 = vmatpush.msra.mxu1 %v3487_v61  ;;  %2365 = vmatpush.msra.mxu3 %v3511_v37 }
  0xe2   :  { %2052 = vmatmul.f32.gmra.mxu2 %v1968_v11  ;;  %2260 = vmatpush.msra.mxu0 %v3509_v23 }
  0xe3   :  { %v2410_v63 = vsel %vm156_vm0, %v2381_v55, 0.0  ;;  %2085 = vmatmul.f32.gmra.mxu3 %v1969_v10  ;;  %2293 = vmatpush.msra.mxu1 %v3497_v2 }
  0xe4   :  { %v791_v59 = vpop.f32.mrf.mxu0  ;;  %2411 = vadd.xlane.f32.xlu2 %v2410_v63  ;;  %2263 = vmatpush.msra.mxu0 %v3517_v21 }
  0xe5   :  { %v792_v61 = vadd.f32 %v791_v59, %v755_v51  ;;  %v820_v17 = vpop.f32.mrf.mxu1  ;;  %v863_v62 = vpop.f32.mrf.mxu2  ;;  %2295 = vmatpush.msra.mxu1 %v3511_v37  ;;  %2338 = vmatpush.msra.mxu2 %v2230_v8  ;;  %v2192_v37 = vsub.f32 %v3630_v12, %v2191_v0  ;;  %v905_v8 = vadd.f32 %v904_v9, %v855_v46 }
  0xe6   :  { %v908_v23 = vpop.f32.mrf.mxu3  ;;  %2266 = vmatpush.msra.mxu0 %v3535_v19  ;;  %2367 = vmatpush.msra.mxu3 %v3519_v38 }
  0xe7   :  { %v821_v2 = vadd.f32 %v820_v17, %v792_v61  ;;  %1972 = vmatmul.f32.gmra.mxu0 %v1971_v57  ;;  %2297 = vmatpush.msra.mxu1 %v3519_v38  ;;  %v2193_v1 = vand.u32 4294901760, %v2192_v37  ;;  %v909_v39 = vadd.f32 %v908_v23, %v863_v62 }
  0xe8   :  { %2017 = vmatmul.f32.gmra.mxu1 %v3583_v54 }
  0xe9   :  { %v2382_v21 = vmul.f32 %v821_v2, %v2984_v4 }
  0xea   :  { %2186 = vmatmul.f32.vlgmr.msrb.gmra.mxu2 %v2185_v43 }
  0xeb   :  { %v2413_v34 = vsel %vm2400_vm1, %v2382_v21, 0.0  ;;  %2235 = vmatmul.f32.vlgmr.msrb.gmra.mxu3 %v3592_v47 }
  0xec   :  { %v938_v48 = vpop.f32.mrf.mxu0  ;;  %2414 = vadd.xlane.f32.xlu2 %v2413_v34 }
  0xed   :  { %v939_v19 = vadd.f32 %v938_v48, %v905_v8  ;;  %v970_v18 = vpop.f32.mrf.mxu1  ;;  %v1009_v42 = vpop.f32.mrf.mxu2 }
  0xee   :  { %v1038_v29 = vpop.f32.mrf.mxu3 }
  0xef   :  { %v971_v38 = vadd.f32 %v970_v18, %v939_v19  ;;  %2118 = vmatmul.f32.vlgmr.msrb.gmra.mxu0 %v3550_v58 }
  0xf0   :  { %2147 = vmatmul.f32.vlgmr.msrb.gmra.mxu1 %v3550_v58 }
  0xf1   :  { %v1010_v4 = vadd.f32 %v1009_v42, %v971_v38 }
  0xf2   :  { %2194 = vmatmul.f32.gmra.mxu2 %v2193_v1 }
  0xf3   :  { %v1039_v27 = vadd.f32 %v1038_v29, %v1010_v4  ;;  %2239 = vmatmul.f32.gmra.mxu3 %v3616_v44 }
  0xf4   :  { %v943_v14 = vpop.f32.mrf.mxu0 }
  0xf5   :  { %v944_v52 = vadd.f32 %v943_v14, %v909_v39  ;;  %v976_v11 = vpop.f32.mrf.mxu1  ;;  %v1013_v45 = vpop.f32.mrf.mxu2  ;;  %v2383_v28 = vmul.f32 %v1039_v27, %v2997_v41 }
  0xf6   :  { %v1042_v26 = vpop.f32.mrf.mxu3 }
  0xf7   :  { %v977_v10 = vadd.f32 %v976_v11, %v944_v52  ;;  %2122 = vmatmul.f32.gmra.mxu0 %v3583_v54  ;;  %v2416_v20 = vsel %vm156_vm0, %v2383_v28, 0.0 }
  0xf8   :  { %2417 = vadd.xlane.f32.xlu0 %v2416_v20  ;;  %2151 = vmatmul.f32.gmra.mxu1 %v3583_v54 }
  0xf9   :  { %v1014_v58 = vadd.f32 %v1013_v45, %v977_v10 }
  0xfa   :  { %2340 = vmatmul.f32.vlgmr.msra.gmra.mxu2 %v3592_v47 }
  0xfb   :  { %v1043_v3 = vadd.f32 %v1042_v26, %v1014_v58  ;;  %2369 = vmatmul.f32.vlgmr.msra.gmra.mxu3 %v3592_v47 }
  0xfc   :  { %v1077_v16 = vpop.f32.mrf.mxu0 }
  0xfd   :  { %v1126_v24 = vpop.f32.mrf.mxu1  ;;  %v1160_v46 = vpop.f32.mrf.mxu2  ;;  %v2384_v41 = vmul.f32 %v1043_v3, %v3027_v40 }
  0xfe   :  { %v1192_v9 = vpop.f32.mrf.mxu3  ;;  %v1127_v54 = vadd.f32 %v1126_v24, %v1077_v16 }
  0xff   :  { %2269 = vmatmul.f32.vlgmr.msra.gmra.mxu0 %v3605_v30  ;;  %v2419_v53 = vsel %vm2400_vm1, %v2384_v41, 0.0 }
 0x100   :  { %2420 = vadd.xlane.f32.xlu1 %v2419_v53  ;;  %2301 = vmatmul.f32.vlgmr.msra.gmra.mxu1 %v2183_v56  ;;  %v1161_v49 = vadd.f32 %v1160_v46, %v1127_v54 }
 0x102   :  { %2344 = vmatmul.f32.gmra.mxu2 %v3616_v44  ;;  %v1193_v40 = vadd.f32 %v1192_v9, %v1161_v49 }
 0x103   :  { %2373 = vmatmul.f32.gmra.mxu3 %v3616_v44 }
 0x104   :  { %v1085_v47 = vpop.f32.mrf.mxu0 }
 0x105   :  { %v1130_v36 = vpop.f32.mrf.mxu1  ;;  %v1165_v32 = vpop.f32.mrf.mxu2 }
 0x106   :  { %v1198_v55 = vpop.f32.mrf.mxu3  ;;  %v1131_v51 = vadd.f32 %v1130_v36, %v1085_v47 }
 0x107   :  { %2274 = vmatmul.f32.gmra.mxu0 %v3630_v12 }
 0x108   :  { %2307 = vmatmul.f32.gmra.mxu1 %v2191_v0  ;;  %v1166_v61 = vadd.f32 %v1165_v32, %v1131_v51 }
 0x10a   :  { %v1199_v44 = vadd.f32 %v1198_v55, %v1166_v61 }
 0x10c   :  { %v1231_v63 = vpop.f32.mrf.mxu0 }
 0x10d   :  { %v1232_v57 = vadd.f32 %v1231_v63, %v1193_v40  ;;  %v1260_v59 = vpop.f32.mrf.mxu1  ;;  %v1299_v30 = vpop.f32.mrf.mxu2 }
 0x10e   :  { %v1348_v56 = vpop.f32.mrf.mxu3 }
 0x10f   :  { %v1261_v17 = vadd.f32 %v1260_v59, %v1232_v57  ;;  %v1349_v34 = vadd.f32 %v1348_v56, %v1299_v30 }
 0x111   :  { %v2385_v62 = vmul.f32 %v1261_v17, %v3143_v25 }
 0x113   :  { %v2422_v23 = vsel %vm156_vm0, %v2385_v62, 0.0 }
 0x114   :  { %v1235_v43 = vpop.f32.mrf.mxu0  ;;  %2423 = vadd.xlane.f32.xlu2 %v2422_v23 }
 0x115   :  { %v1236_v2 = vadd.f32 %v1235_v43, %v1199_v44  ;;  %v1264_v21 = vpop.f32.mrf.mxu1  ;;  %v1307_v12 = vpop.f32.mrf.mxu2 }
 0x116   :  { %v1352_v0 = vpop.f32.mrf.mxu3 }
 0x117   :  { %v1265_v37 = vadd.f32 %v1264_v21, %v1236_v2  ;;  %v1353_v4 = vadd.f32 %v1352_v0, %v1307_v12 }
 0x119   :  { %v2386_v8 = vmul.f32 %v1265_v37, %v3172_v6 }
 0x11b   :  { %v2425_v48 = vsel %vm2400_vm1, %v2386_v8, 0.0 }
 0x11c   :  { %v1382_v19 = vpop.f32.mrf.mxu0  ;;  %2426 = vadd.xlane.f32.xlu0 %v2425_v48 }
 0x11d   :  { %v1383_v18 = vadd.f32 %v1382_v19, %v1349_v34  ;;  %v1414_v42 = vpop.f32.mrf.mxu1  ;;  %v1453_v25 = vpop.f32.mrf.mxu2 }
 0x11e   :  { %v1482_v29 = vpop.f32.mrf.mxu3 }
 0x11f   :  { %v1415_v1 = vadd.f32 %v1414_v42, %v1383_v18 }
 0x121   :  { %v1454_v38 = vadd.f32 %v1453_v25, %v1415_v1 }
 0x123   :  { %v1483_v39 = vadd.f32 %v1482_v29, %v1454_v38 }
 0x124   :  { %v1387_v27 = vpop.f32.mrf.mxu0 }
 0x125   :  { %v1388_v14 = vadd.f32 %v1387_v27, %v1353_v4  ;;  %v1420_v52 = vpop.f32.mrf.mxu1  ;;  %v1457_v11 = vpop.f32.mrf.mxu2  ;;  %v2387_v45 = vmul.f32 %v1483_v39, %v3182_v22 }
 0x126   :  { %v1486_v6 = vpop.f32.mrf.mxu3 }
 0x127   :  { %v1421_v28 = vadd.f32 %v1420_v52, %v1388_v14  ;;  %v2428_v26 = vsel %vm156_vm0, %v2387_v45, 0.0 }
 0x128   :  { %2429 = vadd.xlane.f32.xlu1 %v2428_v26 }
 0x129   :  { %v1458_v10 = vadd.f32 %v1457_v11, %v1421_v28 }
 0x12b   :  { %v1487_v20 = vadd.f32 %v1486_v6, %v1458_v10 }
 0x12c   :  { %v1521_v58 = vpop.f32.mrf.mxu0 }
 0x12d   :  { %v1570_v3 = vpop.f32.mrf.mxu1  ;;  %v1604_v16 = vpop.f32.mrf.mxu2  ;;  %v2388_v24 = vmul.f32 %v1487_v20, %v3212_v50 }
 0x12e   :  { %v1636_v46 = vpop.f32.mrf.mxu3  ;;  %v1571_v9 = vadd.f32 %v1570_v3, %v1521_v58 }
 0x12f   :  { %v2431_v41 = vsel %vm2400_vm1, %v2388_v24, 0.0 }
 0x130   :  { %2432 = vadd.xlane.f32.xlu2 %v2431_v41  ;;  %v1605_v36 = vadd.f32 %v1604_v16, %v1571_v9 }
 0x132   :  { %v1637_v32 = vadd.f32 %v1636_v46, %v1605_v36 }
 0x134   :  { %v1529_v53 = vpop.f32.mrf.mxu0 }
 0x135   :  { %v1574_v54 = vpop.f32.mrf.mxu1  ;;  %v1609_v22 = vpop.f32.mrf.mxu2 }
 0x136   :  { %v1642_v47 = vpop.f32.mrf.mxu3  ;;  %v1575_v55 = vadd.f32 %v1574_v54, %v1529_v53 }
 0x138   :  { %v1610_v59 = vadd.f32 %v1609_v22, %v1575_v55 }
 0x13a   :  { %v1643_v56 = vadd.f32 %v1642_v47, %v1610_v59 }
 0x13c   :  { %v1675_v49 = vpop.f32.mrf.mxu0 }
 0x13d   :  { %v1676_v40 = vadd.f32 %v1675_v49, %v1637_v32  ;;  %v1704_v51 = vpop.f32.mrf.mxu1  ;;  %v1743_v63 = vpop.f32.mrf.mxu2 }
 0x13e   :  { %v1792_v57 = vpop.f32.mrf.mxu3 }
 0x13f   :  { %v1705_v30 = vadd.f32 %v1704_v51, %v1676_v40  ;;  %v1793_v12 = vadd.f32 %v1792_v57, %v1743_v63 }
 0x141   :  { %v2389_v50 = vmul.f32 %v1705_v30, %v3325_v5 }
 0x143   :  { %v2434_v61 = vsel %vm156_vm0, %v2389_v50, 0.0 }
 0x144   :  { %v1679_v17 = vpop.f32.mrf.mxu0  ;;  %2435 = vadd.xlane.f32.xlu0 %v2434_v61 }
 0x145   :  { %v1680_v62 = vadd.f32 %v1679_v17, %v1643_v56  ;;  %v1708_v44 = vpop.f32.mrf.mxu1  ;;  %v1751_v23 = vpop.f32.mrf.mxu2 }
 0x146   :  { %v1796_v43 = vpop.f32.mrf.mxu3 }
 0x147   :  { %v1709_v2 = vadd.f32 %v1708_v44, %v1680_v62  ;;  %v1797_v42 = vadd.f32 %v1796_v43, %v1751_v23 }
 0x149   :  { %v2390_v21 = vmul.f32 %v1709_v2, %v3356_v35 }
 0x14b   :  { %v2437_v0 = vsel %vm2400_vm1, %v2390_v21, 0.0 }
 0x14c   :  { %v1826_v37 = vpop.f32.mrf.mxu0  ;;  %2438 = vadd.xlane.f32.xlu1 %v2437_v0 }
 0x14d   :  { %v1827_v8 = vadd.f32 %v1826_v37, %v1793_v12  ;;  %v1858_v34 = vpop.f32.mrf.mxu1  ;;  %v1897_v5 = vpop.f32.mrf.mxu2 }
 0x14e   :  { %v1926_v48 = vpop.f32.mrf.mxu3 }
 0x14f   :  { %v1859_v19 = vadd.f32 %v1858_v34, %v1827_v8 }
 0x151   :  { %v1898_v18 = vadd.f32 %v1897_v5, %v1859_v19 }
 0x153   :  { %v1927_v25 = vadd.f32 %v1926_v48, %v1898_v18 }
 0x154   :  { %v1831_v29 = vpop.f32.mrf.mxu0 }
 0x155   :  { %v1832_v1 = vadd.f32 %v1831_v29, %v1797_v42  ;;  %v1864_v38 = vpop.f32.mrf.mxu1  ;;  %v1901_v4 = vpop.f32.mrf.mxu2  ;;  %v2391_v39 = vmul.f32 %v1927_v25, %v3368_v13 }
 0x156   :  { %v1930_v35 = vpop.f32.mrf.mxu3 }
 0x157   :  { %v1865_v27 = vadd.f32 %v1864_v38, %v1832_v1  ;;  %v2440_v14 = vsel %vm156_vm0, %v2391_v39, 0.0  ;;  %v2406_v38 = vpop.xlane.xlu1 %2405  ;;  %v2412_v39 = vpop.xlane.xlu2 %2411 }
 0x158   :  { %2441 = vadd.xlane.f32.xlu2 %v2440_v14 }
 0x159   :  { %v1902_v52 = vadd.f32 %v1901_v4, %v1865_v27  ;;  %v2399_v4 = vpop.xlane.xlu0 %2398 }
 0x15b   :  { %v1931_v11 = vadd.f32 %v1930_v35, %v1902_v52 }
 0x15c   :  { %v1965_v45 = vpop.f32.mrf.mxu0 }
 0x15d   :  { %v2014_v6 = vpop.f32.mrf.mxu1  ;;  %v2048_v28 = vpop.f32.mrf.mxu2  ;;  %v2392_v26 = vmul.f32 %v1931_v11, %v3400_v7 }
 0x15e   :  { %v2080_v10 = vpop.f32.mrf.mxu3  ;;  %v2015_v58 = vadd.f32 %v2014_v6, %v1965_v45  ;;  %v2498_v45 = vlaneseq }
 0x15f   :  { %v2443_v20 = vsel %vm2400_vm1, %v2392_v26, 0.0  ;;  %v2409_v35 = vpop.xlane.xlu1 %2408  ;;  %v2415_v14 = vpop.xlane.xlu2 %2414 }
 0x160   :  { %2444 = vadd.xlane.f32.xlu0 %v2443_v20  ;;  %v2049_v46 = vadd.f32 %v2048_v28, %v2015_v58  ;;  %v3688_v26 = vand.u32 127, %v2498_v45  ;;  %v2461_v58 = vmul.f32 0.25, %v2409_v35 }
 0x161   :  { %v2403_v27 = vpop.xlane.xlu0 %2402 }
 0x162   :  { %v2081_v41 = vadd.f32 %v2080_v10, %v2049_v46  ;;  %v2459_v20 = vmul.f32 0.25, %v2403_v27 }
 0x164   :  { %v1973_v3 = vpop.f32.mrf.mxu0 }
 0x165   :  { %v2018_v16 = vpop.f32.mrf.mxu1  ;;  %v2053_v13 = vpop.f32.mrf.mxu2 }
 0x166   :  { %v2086_v24 = vpop.f32.mrf.mxu3  ;;  %v2019_v9 = vadd.f32 %v2018_v16, %v1973_v3  ;;  %v2463_v3 = vmul.f32 0.25, %v2415_v14  ;;  %v2458_v16 = vmul.f32 0.25, %v2399_v4 }
 0x168   :  { %v2054_v32 = vadd.f32 %v2053_v13, %v2019_v9  ;;  %v2460_v13 = vmul.f32 0.25, %v2406_v38 }
 0x16a   :  { %v2087_v49 = vadd.f32 %v2086_v24, %v2054_v32 }
 0x16b   :  { %v2418_v52 = vpop.xlane.xlu0 %2417 }
 0x16c   :  { %v2119_v53 = vpop.f32.mrf.mxu0 }
 0x16d   :  { %v2120_v54 = vadd.f32 %v2119_v53, %v2081_v41  ;;  %v2148_v22 = vpop.f32.mrf.mxu1  ;;  %v2187_v47 = vpop.f32.mrf.mxu2  ;;  %v2462_v41 = vmul.f32 0.25, %v2412_v39 }
 0x16e   :  { %v2236_v36 = vpop.f32.mrf.mxu3 }
 0x16f   :  { %v2149_v55 = vadd.f32 %v2148_v22, %v2120_v54  ;;  %v2237_v61 = vadd.f32 %v2236_v36, %v2187_v47  ;;  %v2464_v47 = vmul.f32 0.25, %v2418_v52 }
 0x171   :  { %v2393_v7 = vmul.f32 %v2149_v55, %v3525_v31 }
 0x173   :  { %v2446_v40 = vsel %vm156_vm0, %v2393_v7, 0.0 }
 0x174   :  { %v2123_v51 = vpop.f32.mrf.mxu0  ;;  %2447 = vadd.xlane.f32.xlu1 %v2446_v40  ;;  %v2505_v40 = vperm.slane %v2460_v13, %v3688_v26 }
 0x175   :  { %v2124_v63 = vadd.f32 %v2123_v51, %v2087_v49  ;;  %v2152_v57 = vpop.f32.mrf.mxu1  ;;  %v2195_v59 = vpop.f32.mrf.mxu2  ;;  %v2500_v49 = vperm.slane %v2458_v16, %v3688_v26 }
 0x176   :  { %v2240_v30 = vpop.f32.mrf.mxu3 }
 0x177   :  { %v2153_v50 = vadd.f32 %v2152_v57, %v2124_v63  ;;  %v2241_v12 = vadd.f32 %v2240_v30, %v2195_v59  ;;  %v2508_v57 = vperm.slane %v2462_v41, %v3688_v26 }
 0x179   :  { %v2394_v56 = vmul.f32 %v2153_v50, %v3558_v33 }
 0x17b   :  { %v2449_v17 = vsel %vm2400_vm1, %v2394_v56, 0.0 }
 0x17c   :  { %v2270_v62 = vpop.f32.mrf.mxu0  ;;  %2450 = vadd.xlane.f32.xlu2 %v2449_v17  ;;  %v2511_v17 = vperm.slane %v2464_v47, %v3688_v26 }
 0x17d   :  { %v2271_v44 = vadd.f32 %v2270_v62, %v2237_v61  ;;  %v2302_v23 = vpop.f32.mrf.mxu1  ;;  %v2341_v31 = vpop.f32.mrf.mxu2 }
 0x17e   :  { %v2370_v43 = vpop.f32.mrf.mxu3 }
 0x17f   :  { %v2303_v2 = vadd.f32 %v2302_v23, %v2271_v44 }
 0x181   :  { %v2342_v21 = vadd.f32 %v2341_v31, %v2303_v2 }
 0x183   :  { %v2371_v0 = vadd.f32 %v2370_v43, %v2342_v21 }
 0x184   :  { %v2275_v37 = vpop.f32.mrf.mxu0 }
 0x185   :  { %v2276_v8 = vadd.f32 %v2275_v37, %v2241_v12  ;;  %v2308_v34 = vpop.f32.mrf.mxu1  ;;  %v2395_v5 = vmul.f32 %v2371_v0, %v3570_v60  ;;  %v2345_v48 = vpop.f32.mrf.mxu2 }
 0x186   :  { %v2374_v18 = vpop.f32.mrf.mxu3  ;;  %v2421_v60 = vpop.xlane.xlu1 %2420 }
 0x187   :  { %v2309_v33 = vadd.f32 %v2308_v34, %v2276_v8  ;;  %v2452_v19 = vsel %vm156_vm0, %v2395_v5, 0.0  ;;  %v2424_v11 = vpop.xlane.xlu2 %2423  ;;  %v2465_v24 = vmul.f32 0.25, %v2421_v60 }
 0x188   :  { %2453 = vadd.xlane.f32.xlu0 %v2452_v19  ;;  %v2466_v55 = vmul.f32 0.25, %v2424_v11 }
 0x189   :  { %v2346_v42 = vadd.f32 %v2345_v48, %v2309_v33 }
 0x18a   :  { %v2514_v23 = vperm.slane %v2466_v55, %v3688_v26 }
 0x18b   :  { %v2375_v25 = vadd.f32 %v2374_v18, %v2346_v42 }
 0x18d   :  { %v2396_v29 = vmul.f32 %v2375_v25, %v3597_v15  ;;  %v3691_v15 = vadd.s32 4294967288, %v3688_v26 }
 0x18f   :  { %v2455_v1 = vsel %vm2400_vm1, %v2396_v29, 0.0  ;;  %v2427_v28 = vpop.xlane.xlu0 %2426  ;;  %v2502_v54 = vperm.slane %v2459_v20, %v3691_v15  ;;  %v2506_v22 = vperm.slane %v2461_v58, %v3691_v15  ;;  %v2509_v32 = vperm.slane %v2463_v3, %v3691_v15 }
 0x190   :  { %2456 = vadd.xlane.f32.xlu1 %v2455_v1  ;;  %v2467_v9 = vmul.f32 0.25, %v2427_v28  ;;  %v2512_v51 = vperm.slane %v2465_v24, %v3691_v15 }
 0x191   :  { %v2504_v56 = vsel %vm2503_vm2, %v2502_v54, %v2500_v49  ;;  %v2507_v61 = vsel %vm2503_vm2, %v2506_v22, %v2505_v40  ;;  %v2510_v44 = vsel %vm2503_vm2, %v2509_v32, %v2508_v57 }
 0x192   :  { %v2515_v59 = vperm.slane %v2467_v9, %v3691_v15  ;;  %v2513_v43 = vsel %vm2503_vm2, %v2512_v51, %v2511_v17  ;;  %v2533_v12 = vsel %vm2532_vm3, %v2507_v61, %v2504_v56 }
 0x193   :  { %v2535_v34 = vsel %vm2534_vm4, %v2510_v44, %v2533_v12 }
 0x194   :  { %v2516_v0 = vsel %vm2503_vm2, %v2515_v59, %v2514_v23  ;;  %v2537_v33 = vsel %vm2536_vm5, %v2513_v43, %v2535_v34 }
 0x195   :  { %v2539_v18 = vsel %vm2538_vm6, %v2516_v0, %v2537_v33 }
 0x19b   :  { %v2430_v6 = vpop.xlane.xlu1 %2429 }
 0x19c   :  { %v2468_v63 = vmul.f32 0.25, %v2430_v6 }
 0x19e   :  { %v2517_v2 = vperm.slane %v2468_v63, %v3688_v26 }
 0x1a3   :  { %v2433_v10 = vpop.xlane.xlu2 %2432 }
 0x1a4   :  { %v2469_v36 = vmul.f32 0.25, %v2433_v10 }
 0x1a6   :  { %v2518_v62 = vperm.slane %v2469_v36, %v3691_v15 }
 0x1a8   :  { %v2519_v5 = vsel %vm2503_vm2, %v2518_v62, %v2517_v2 }
 0x1a9   :  { %v2541_v29 = vsel %vm2540_vm7, %v2519_v5, %v2539_v18 }
 0x1b7   :  { %v2436_v53 = vpop.xlane.xlu0 %2435 }
 0x1b8   :  { %v2470_v30 = vmul.f32 0.25, %v2436_v53 }
 0x1ba   :  { %v2520_v37 = vperm.slane %v2470_v30, %v3688_v26 }
 0x1bf   :  { %v2439_v46 = vpop.xlane.xlu1 %2438 }
 0x1c0   :  { %v2471_v7 = vmul.f32 0.25, %v2439_v46 }
 0x1c2   :  { %v2521_v31 = vperm.slane %v2471_v7, %v3691_v15 }
 0x1c4   :  { %v2522_v19 = vsel %vm2503_vm2, %v2521_v31, %v2520_v37 }
 0x1c5   :  { %v2543_v1 = vsel %vm2542_vm8, %v2522_v19, %v2541_v29 }
 0x1cb   :  { %v2442_v50 = vpop.xlane.xlu2 %2441 }
 0x1cc   :  { %v2472_v21 = vmul.f32 0.25, %v2442_v50 }
 0x1ce   :  { %v2523_v42 = vperm.slane %v2472_v21, %v3688_v26 }
 0x1d3   :  { %v2445_v8 = vpop.xlane.xlu0 %2444 }
 0x1d4   :  { %v2473_v48 = vmul.f32 0.25, %v2445_v8 }
 0x1d6   :  { %v2524_v25 = vperm.slane %v2473_v48, %v3691_v15 }
 0x1d8   :  { %v2525_v38 = vsel %vm2503_vm2, %v2524_v25, %v2523_v42 }
 0x1d9   :  { %v2545_v4 = vsel %vm2544_vm9, %v2525_v38, %v2543_v1 }
 0x1da   :  { %2550 = vst.msk [vmem:[#allocation8] sm:$0xff] %vm2549_vm10, %v2545_v4 }
 0x1e7   :  { %v2448_v39 = vpop.xlane.xlu1 %2447 }
 0x1e8   :  { %v2474_v60 = vmul.f32 0.25, %v2448_v39 }
 0x1ea   :  { %v2526_v28 = vperm.slane %v2474_v60, %v3688_v26 }
 0x1ef   :  { %v2451_v35 = vpop.xlane.xlu2 %2450 }
 0x1f0   :  { %v2475_v14 = vmul.f32 0.25, %v2451_v35 }
 0x1f2   :  { %v2527_v45 = vperm.slane %v2475_v14, %v3691_v15 }
 0x1f4   :  { %v2528_v58 = vsel %vm2503_vm2, %v2527_v45, %v2526_v28 }
 0x1fb   :  { %v2454_v27 = vpop.xlane.xlu0 %2453 }
 0x1fc   :  { %v2476_v52 = vmul.f32 0.25, %v2454_v27 }
 0x1fe   :  { %v2529_v10 = vperm.slane %v2476_v52, %v3688_v26 }
 0x203   :  { %v2457_v11 = vpop.xlane.xlu1 %2456 }
 0x204   :  { %v2477_v6 = vmul.f32 0.25, %v2457_v11 }
 0x206   :  { %v2530_v20 = vperm.slane %v2477_v6, %v3691_v15 }
 0x208   :  { %v2531_v3 = vsel %vm2503_vm2, %v2530_v20, %v2529_v10 }
 0x209   :  { %v2546_v16 = vsel %vm2532_vm3, %v2531_v3, %v2528_v58 }
 0x20a   :  { %2552 = vst.msk [vmem:[#allocation8 + $0x8] sm:$0x3] %vm2551_vm11, %v2546_v16 }
 0x20b   :  { %2565 = dma.vmem_to_hbm [thread:$0]  %s2558_s27, 256, %s2560_s30, [#allocation4], %s2684_s20, %s2684_s20, %s2685_s21  }
 0x20c   :  { %2681 = dma.done.wait [#allocation4], 256  }
 0x20d   :  { %2682 = vsyncadd [#allocation4], 4294967040 }
 0x20e   :  { %2570 = vsyncpa [#allocation3], 1 }
 0x20f   :  { %2571 = vsyncpa [#allocation6], 1 }
 0x210   :  { %2572 = vsyncpa [#allocation4], 1 }

</bundles_post_ra>
